<compile_context>
chip_gen: v7x
topology: tpu7x:2x2x1
jax: 0.10.0
libtpu: 0.0.40
codegen_flags: <defaults>
</compile_context>

<pallas_src>
import functools
import numpy as np

import jax
import jax.numpy as jnp
from jax import lax
from jax.experimental import pallas as pl
from jax.experimental.pallas import tpu as pltpu

LATENT_DIM = 4
OBS_DIM = 2
NHIDDEN = 20    # LatentODEfunc / decoder hidden
RHIDDEN = 20    # RecognitionRNN GRU hidden
DT = 0.01       # torch.arange(0, output_length, 0.01) spacing
F = 128         # lane-padded feature width (vreg lane count)


def _elu(x):
    # ELU(alpha=1); exp only sees non-positive inputs (no inf in unselected branch).
    return jnp.where(x > 0, x, jnp.exp(jnp.minimum(x, 0.0)) - 1.0)


# ---------------------------------------------------------------------------
# Fused kernel: GRU recognition -> Linear head -> fixed-step RK4 latent ODE ->
# batched ReLU-MLP decode. All weights are lane-padded to width F (=128).
# ---------------------------------------------------------------------------
def latent_ode_kernel(x_ref, wih_ref, whh_ref, bih_ref, bhh_ref, lw_ref, lb_ref,
                      fw1_ref, fb1_ref, fw2_ref, fb2_ref, fw3_ref, fb3_ref,
                      fw4_ref, fb4_ref, fw5_ref, fb5_ref,
                      dw1_ref, db1_ref, dw2_ref, db2_ref,
                      out_ref, gi_scratch, zs_scratch):
    T_in, B, obs = x_ref.shape
    T_out = out_ref.shape[0]

    # ---------------- GRU recognition over reversed sequence ----------------
    # Precompute the input-gate term for every timestep as ONE batched matmul.
    x = x_ref[...].astype(jnp.float32)                              # (T, B, obs)
    gi_all = jnp.dot(x.reshape(T_in * B, obs), wih_ref[...],
                     preferred_element_type=jnp.float32)            # (T*B, 3F)
    gi_scratch[...] = gi_all.reshape(T_in, B, 3 * F) + bih_ref[...]

    bhh = jnp.broadcast_to(bhh_ref[...], (B, 3 * F))                # hoisted

    def gru_body(t, h):
        gi = gi_scratch[t]                                          # (B, 3F)
        gh = jnp.dot(h, whh_ref[...], preferred_element_type=jnp.float32) + bhh
        # torch GRU gate order: r, z, n; each gate lives in its own 128-lane slot.
        r = jax.nn.sigmoid(gi[:, 0:F] + gh[:, 0:F])
        zg = jax.nn.sigmoid(gi[:, F:2 * F] + gh[:, F:2 * F])
        n = jnp.tanh(gi[:, 2 * F:3 * F] + r * gh[:, 2 * F:3 * F])
        return (1.0 - zg) * n + zg * h

    h = lax.fori_loop(0, T_in, gru_body, jnp.zeros((B, F), jnp.float32))
    z0 = jnp.dot(h, lw_ref[...], preferred_element_type=jnp.float32) + lb_ref[...]

    # ---------------- latent ODE: fixed-step RK4 on the 0.01 grid ----------------
    # TODO(synk): torchdiffeq's default odeint is adaptive dopri5; this is a
    # fixed-step RK4 with step == the 0.01 output spacing (same output grid).
    fb1 = jnp.broadcast_to(fb1_ref[...], (B, F))
    fb2 = jnp.broadcast_to(fb2_ref[...], (B, F))
    fb3 = jnp.broadcast_to(fb3_ref[...], (B, F))
    fb4 = jnp.broadcast_to(fb4_ref[...], (B, F))
    fb5 = jnp.broadcast_to(fb5_ref[...], (B, F))

    def func(z):
        a = _elu(jnp.dot(z, fw1_ref[...], preferred_element_type=jnp.float32) + fb1)
        a = _elu(jnp.dot(a, fw2_ref[...], preferred_element_type=jnp.float32) + fb2)
        a = _elu(jnp.dot(a, fw3_ref[...], preferred_element_type=jnp.float32) + fb3)
        a = _elu(jnp.dot(a, fw4_ref[...], preferred_element_type=jnp.float32) + fb4)
        return jnp.dot(a, fw5_ref[...], preferred_element_type=jnp.float32) + fb5

    zs_scratch[0] = z0

    def rk4_body(t, z):
        k1 = func(z)
        k2 = func(z + (0.5 * DT) * k1)
        k3 = func(z + (0.5 * DT) * k2)
        k4 = func(z + DT * k3)
        z_new = z + (DT / 6.0) * (k1 + 2.0 * k2 + 2.0 * k3 + k4)
        zs_scratch[t] = z_new                                       # lane-dense (B, F) store
        return z_new

    lax.fori_loop(1, T_out, rk4_body, z0)

    # ---------------- bulk decode (one MXU-friendly matmul, M = T*B) ----------------
    zs = zs_scratch[...].reshape(T_out * B, F)
    dh = jnp.maximum(
        jnp.dot(zs, dw1_ref[...], preferred_element_type=jnp.float32) + db1_ref[...],
        0.0)
    dec = jnp.dot(dh, dw2_ref[...], preferred_element_type=jnp.float32) + db2_ref[...]
    out_ref[...] = dec[:, :OBS_DIM].reshape(T_out, B, OBS_DIM).astype(out_ref.dtype)


# ---------------------------------------------------------------------------
# Parameter construction (deterministic, torch-default-style uniform init).
# Logical (unpadded) shapes; pad_params() produces the lane-padded kernel view.
# ---------------------------------------------------------------------------
def init_params(key):
    keys = jax.random.split(key, 16)

    def lin(k, fan_in, fan_out):
        k1, k2 = jax.random.split(k)
        bound = 1.0 / float(np.sqrt(fan_in))
        w = jax.random.uniform(k1, (fan_in, fan_out), jnp.float32, -bound, bound)
        b = jax.random.uniform(k2, (1, fan_out), jnp.float32, -bound, bound)
        return w, b

    p = {}
    gbound = 1.0 / float(np.sqrt(RHIDDEN))
    # GRU(obs_dim -> RHIDDEN), gates ordered r, z, n along the 3H axis
    p['wih'] = jax.random.uniform(keys[0], (OBS_DIM, 3 * RHIDDEN), jnp.float32, -gbound, gbound)
    p['whh'] = jax.random.uniform(keys[1], (RHIDDEN, 3 * RHIDDEN), jnp.float32, -gbound, gbound)
    p['bih'] = jax.random.uniform(keys[2], (1, 3 * RHIDDEN), jnp.float32, -gbound, gbound)
    p['bhh'] = jax.random.uniform(keys[3], (1, 3 * RHIDDEN), jnp.float32, -gbound, gbound)
    p['lw'], p['lb'] = lin(keys[4], RHIDDEN, LATENT_DIM)      # rec.linear
    # LatentODEfunc MLP
    p['fw1'], p['fb1'] = lin(keys[5], LATENT_DIM, NHIDDEN)
    p['fw2'], p['fb2'] = lin(keys[6], NHIDDEN, NHIDDEN)
    p['fw3'], p['fb3'] = lin(keys[7], NHIDDEN, NHIDDEN)
    p['fw4'], p['fb4'] = lin(keys[8], NHIDDEN, NHIDDEN)
    p['fw5'], p['fb5'] = lin(keys[9], NHIDDEN, LATENT_DIM)
    # LatentODEDecoder
    p['dw1'], p['db1'] = lin(keys[10], LATENT_DIM, NHIDDEN)
    p['dw2'], p['db2'] = lin(keys[11], NHIDDEN, OBS_DIM)
    return p


def pad_params(p):
    """Lane-pad every weight/bias to width F (=128); GRU gates each get a 128 slot."""
    def pad2(w, rows, cols):
        w = jnp.asarray(w, jnp.float32)
        return jnp.pad(w, ((0, rows - w.shape[0]), (0, cols - w.shape[1])))

    def pad_gates(w, rows, H, HP):
        parts = [pad2(w[:, g * H:(g + 1) * H], rows, HP) for g in range(3)]
        return jnp.concatenate(parts, axis=1)

    q = {}
    q['wih'] = pad_gates(p['wih'], OBS_DIM, RHIDDEN, F)   # (2, 3F)
    q['whh'] = pad_gates(p['whh'], F, RHIDDEN, F)         # (F, 3F)
    q['bih'] = pad_gates(p['bih'], 1, RHIDDEN, F)         # (1, 3F)
    q['bhh'] = pad_gates(p['bhh'], 1, RHIDDEN, F)         # (1, 3F)
    q['lw'] = pad2(p['lw'], F, F)
    q['lb'] = pad2(p['lb'], 1, F)
    for name in ('fw1', 'fw2', 'fw3', 'fw4', 'fw5', 'dw1', 'dw2'):
        q[name] = pad2(p[name], F, F)
    for name in ('fb1', 'fb2', 'fb3', 'fb4', 'fb5', 'db1', 'db2'):
        q[name] = pad2(p[name], 1, F)
    return q


# ---------------------------------------------------------------------------
# Forward wrapper (aug=False, quantile=False defaults of the torch module).
# ---------------------------------------------------------------------------
@functools.partial(jax.jit, static_argnames=('output_length',))
def latent_ode_forward(xx, padded, output_length):
    """xx: (B, T, obs_dim) batch-first, like the PyTorch module."""
    B, T_in, _ = xx.shape
    x_rev = jnp.flip(xx, axis=1)                                   # torch.flip(xx, [1])
    x_tm = jnp.transpose(x_rev, (1, 0, 2)).astype(jnp.float32)     # (T, B, obs)

    vmem = pl.BlockSpec(memory_space=pltpu.MemorySpace.VMEM)

    out_tm = pl.pallas_call(
        latent_ode_kernel,
        out_shape=jax.ShapeDtypeStruct((output_length, B, OBS_DIM), jnp.float32),
        in_specs=[vmem] * 21,
        out_specs=vmem,
        scratch_shapes=[
            pltpu.VMEM((T_in, B, 3 * F), jnp.float32),        # precomputed GRU input gates
            pltpu.VMEM((output_length, B, F), jnp.float32),   # latent trajectory (padded)
        ],
    )(x_tm,
      padded['wih'], padded['whh'], padded['bih'], padded['bhh'],
      padded['lw'], padded['lb'],
      padded['fw1'], padded['fb1'], padded['fw2'], padded['fb2'],
      padded['fw3'], padded['fb3'], padded['fw4'], padded['fb4'],
      padded['fw5'], padded['fb5'],
      padded['dw1'], padded['db1'], padded['dw2'], padded['db2'])

    # odeint(...) -> (T, B, L); .permute(1, 0, 2); decoder already applied in-kernel.
    return jnp.transpose(out_tm, (1, 0, 2))                        # (B, T_out, obs)


# ---------------------------------------------------------------------------
# Pure-JAX reference (same math, unpadded weights) for correctness validation.
# ---------------------------------------------------------------------------
def reference_forward(xx, p, output_length):
    H = RHIDDEN
    x_rev = jnp.flip(xx, axis=1)
    B = xx.shape[0]
    h = jnp.zeros((B, H), jnp.float32)
    for t in range(x_rev.shape[1]):
        x = x_rev[:, t, :]
        gi = x @ p['wih'] + p['bih']
        gh = h @ p['whh'] + p['bhh']
        r = jax.nn.sigmoid(gi[:, :H] + gh[:, :H])
        z = jax.nn.sigmoid(gi[:, H:2 * H] + gh[:, H:2 * H])
        n = jnp.tanh(gi[:, 2 * H:] + r * gh[:, 2 * H:])
        h = (1.0 - z) * n + z * h
    z0 = h @ p['lw'] + p['lb']

    def func(z):
        a = jax.nn.elu(z @ p['fw1'] + p['fb1'])
        a = jax.nn.elu(a @ p['fw2'] + p['fb2'])
        a = jax.nn.elu(a @ p['fw3'] + p['fb3'])
        a = jax.nn.elu(a @ p['fw4'] + p['fb4'])
        return a @ p['fw5'] + p['fb5']

    def dec(z):
        a = jnp.maximum(z @ p['dw1'] + p['db1'], 0.0)
        return a @ p['dw2'] + p['db2']

    zs = [z0]
    z = z0
    for _ in range(1, output_length):
        k1 = func(z)
        k2 = func(z + 0.5 * DT * k1)
        k3 = func(z + 0.5 * DT * k2)
        k4 = func(z + DT * k3)
        z = z + (DT / 6.0) * (k1 + 2.0 * k2 + 2.0 * k3 + k4)
        zs.append(z)
    pred_z = jnp.stack(zs, axis=1)           # (B, T, L)
    return dec(pred_z)                       # (B, T, obs)


if __name__ == "__main__":
    key = jax.random.PRNGKey(0)
    kp, kx = jax.random.split(key)
    params = init_params(kp)
    padded = pad_params(params)

    B, T_in = 2, 8
    output_length = 8
    xx = jax.random.normal(kx, (B, T_in, OBS_DIM), jnp.float32)

    out = latent_ode_forward(xx, padded, output_length)
    out = jax.block_until_ready(out)
    assert out.shape == (B, output_length, OBS_DIM)

    ref = reference_forward(xx, params, output_length)
    np.testing.assert_allclose(np.asarray(out), np.asarray(ref), rtol=1e-4, atol=1e-4)

    print("KERNEL_OK")
</pallas_src>

<mosaic_0001>
module attributes {stable_mosaic.version = 11 : i64} {
  func.func @latent_ode_kernel(%arg0: memref<8x2x2xf32, #tpu.memory_space<vmem>>, %arg1: memref<2x384xf32, #tpu.memory_space<vmem>>, %arg2: memref<128x384xf32, #tpu.memory_space<vmem>>, %arg3: memref<1x384xf32, #tpu.memory_space<vmem>>, %arg4: memref<1x384xf32, #tpu.memory_space<vmem>>, %arg5: memref<128x128xf32, #tpu.memory_space<vmem>>, %arg6: memref<1x128xf32, #tpu.memory_space<vmem>>, %arg7: memref<128x128xf32, #tpu.memory_space<vmem>>, %arg8: memref<1x128xf32, #tpu.memory_space<vmem>>, %arg9: memref<128x128xf32, #tpu.memory_space<vmem>>, %arg10: memref<1x128xf32, #tpu.memory_space<vmem>>, %arg11: memref<128x128xf32, #tpu.memory_space<vmem>>, %arg12: memref<1x128xf32, #tpu.memory_space<vmem>>, %arg13: memref<128x128xf32, #tpu.memory_space<vmem>>, %arg14: memref<1x128xf32, #tpu.memory_space<vmem>>, %arg15: memref<128x128xf32, #tpu.memory_space<vmem>>, %arg16: memref<1x128xf32, #tpu.memory_space<vmem>>, %arg17: memref<128x128xf32, #tpu.memory_space<vmem>>, %arg18: memref<1x128xf32, #tpu.memory_space<vmem>>, %arg19: memref<128x128xf32, #tpu.memory_space<vmem>>, %arg20: memref<1x128xf32, #tpu.memory_space<vmem>>, %arg21: memref<8x2x2xf32, #tpu.memory_space<vmem>>, %arg22: memref<8x2x384xf32, #tpu.memory_space<vmem>>, %arg23: memref<8x2x128xf32, #tpu.memory_space<vmem>>) attributes {dimension_semantics = [], scalar_prefetch = 0 : i64, scratch_operands = 2 : i64, tpu.core_type = #tpu.core_type<tc>} {
    %c0 = arith.constant 0 : index
    %c0_0 = arith.constant 0 : index
    %c0_1 = arith.constant 0 : index
    %0 = vector.load %arg0[%c0, %c0_0, %c0_1] : memref<8x2x2xf32, #tpu.memory_space<vmem>>, vector<8x2x2xf32>
    %1 = vector.shape_cast %0 : vector<8x2x2xf32> to vector<16x2xf32>
    %c0_2 = arith.constant 0 : index
    %c0_3 = arith.constant 0 : index
    %2 = vector.load %arg1[%c0_2, %c0_3] : memref<2x384xf32, #tpu.memory_space<vmem>>, vector<2x384xf32>
    %cst = arith.constant dense<0.000000e+00> : vector<16x384xf32>
    %3 = tpu.matmul %1, %2, %cst {dimension_numbers = #tpu.dot_dimension_numbers<[1], [0], [0], [1], [0, 0, 1, 1], [], []>} : vector<16x2xf32>, vector<2x384xf32>, vector<16x384xf32> -> vector<16x384xf32>
    %4 = vector.shape_cast %3 : vector<16x384xf32> to vector<8x2x384xf32>
    %c0_4 = arith.constant 0 : index
    %c0_5 = arith.constant 0 : index
    %5 = vector.load %arg3[%c0_4, %c0_5] : memref<1x384xf32, #tpu.memory_space<vmem>>, vector<1x384xf32>
    %6 = vector.shape_cast %5 : vector<1x384xf32> to vector<1x1x384xf32>
    %7 = vector.broadcast %6 : vector<1x1x384xf32> to vector<8x2x384xf32>
    %8 = arith.addf %4, %7 : vector<8x2x384xf32>
    %c0_6 = arith.constant 0 : index
    %c0_7 = arith.constant 0 : index
    %c0_8 = arith.constant 0 : index
    %9 = vector.load %arg22[%c0_6, %c0_7, %c0_8] : memref<8x2x384xf32, #tpu.memory_space<vmem>>, vector<8x2x384xf32>
    tpu.vector_store %arg22[%c0_6, %c0_7, %c0_8], %8 {strides = array<i32>} : memref<8x2x384xf32, #tpu.memory_space<vmem>>, vector<8x2x384xf32>,
    %c0_9 = arith.constant 0 : index
    %c0_10 = arith.constant 0 : index
    %10 = vector.load %arg4[%c0_9, %c0_10] : memref<1x384xf32, #tpu.memory_space<vmem>>, vector<1x384xf32>
    %11 = vector.shape_cast %10 : vector<1x384xf32> to vector<1x384xf32>
    %12 = vector.broadcast %11 : vector<1x384xf32> to vector<2x384xf32>
    %cst_11 = arith.constant 0.000000e+00 : f32
    %13 = vector.broadcast %cst_11 : f32 to vector<2x128xf32>
    %c0_i32 = arith.constant 0 : i32
    %c8_i32 = arith.constant 8 : i32
    %14 = arith.addi %c0_i32, %c8_i32 : i32
    %c1_i32 = arith.constant 1 : i32
    %15 = scf.for %arg24 = %c0_i32 to %14 step %c1_i32 iter_args(%arg25 = %13) -> (vector<2x128xf32>)  : i32 {
      %58 = arith.index_cast %arg24 : i32 to index
      %c0_51 = arith.constant 0 : index
      %c0_52 = arith.constant 0 : index
      %59 = vector.load %arg22[%58, %c0_51, %c0_52] : memref<8x2x384xf32, #tpu.memory_space<vmem>>, vector<1x2x384xf32>
      %60 = vector.shape_cast %59 : vector<1x2x384xf32> to vector<2x384xf32>
      %c0_53 = arith.constant 0 : index
      %c0_54 = arith.constant 0 : index
      %61 = vector.load %arg2[%c0_53, %c0_54] : memref<128x384xf32, #tpu.memory_space<vmem>>, vector<128x384xf32>
      %cst_55 = arith.constant dense<0.000000e+00> : vector<2x384xf32>
      %62 = tpu.matmul %arg25, %61, %cst_55 {dimension_numbers = #tpu.dot_dimension_numbers<[1], [0], [0], [1], [0, 0, 1, 1], [], []>} : vector<2x128xf32>, vector<128x384xf32>, vector<2x384xf32> -> vector<2x384xf32>
      %63 = arith.addf %62, %12 : vector<2x384xf32>
      %64 = vector.extract_strided_slice %60 {offsets = [0, 0], sizes = [2, 128], strides = [1, 1]} : vector<2x384xf32> to vector<2x128xf32>
      %65 = vector.extract_strided_slice %63 {offsets = [0, 0], sizes = [2, 128], strides = [1, 1]} : vector<2x384xf32> to vector<2x128xf32>
      %66 = arith.addf %64, %65 : vector<2x128xf32>
      %67 = arith.negf %66 : vector<2x128xf32>
      %68 = math.exp %67 : vector<2x128xf32>
      %cst_56 = arith.constant 1.000000e+00 : f32
      %69 = vector.broadcast %cst_56 : f32 to vector<2x128xf32>
      %70 = arith.addf %69, %68 : vector<2x128xf32>
      %71 = arith.divf %69, %70 : vector<2x128xf32>
      %72 = vector.extract_strided_slice %60 {offsets = [0, 128], sizes = [2, 128], strides = [1, 1]} : vector<2x384xf32> to vector<2x128xf32>
      %73 = vector.extract_strided_slice %63 {offsets = [0, 128], sizes = [2, 128], strides = [1, 1]} : vector<2x384xf32> to vector<2x128xf32>
      %74 = arith.addf %72, %73 : vector<2x128xf32>
      %75 = arith.negf %74 : vector<2x128xf32>
      %76 = math.exp %75 : vector<2x128xf32>
      %cst_57 = arith.constant 1.000000e+00 : f32
      %77 = vector.broadcast %cst_57 : f32 to vector<2x128xf32>
      %78 = arith.addf %77, %76 : vector<2x128xf32>
      %79 = arith.divf %77, %78 : vector<2x128xf32>
      %80 = vector.extract_strided_slice %60 {offsets = [0, 256], sizes = [2, 128], strides = [1, 1]} : vector<2x384xf32> to vector<2x128xf32>
      %81 = vector.extract_strided_slice %63 {offsets = [0, 256], sizes = [2, 128], strides = [1, 1]} : vector<2x384xf32> to vector<2x128xf32>
      %82 = arith.mulf %71, %81 : vector<2x128xf32>
      %83 = arith.addf %80, %82 : vector<2x128xf32>
      %84 = math.tanh %83 : vector<2x128xf32>
      %cst_58 = arith.constant 1.000000e+00 : f32
      %85 = vector.broadcast %cst_58 : f32 to vector<2x128xf32>
      %86 = arith.subf %85, %79 : vector<2x128xf32>
      %87 = arith.mulf %86, %84 : vector<2x128xf32>
      %88 = arith.mulf %79, %arg25 : vector<2x128xf32>
      %89 = arith.addf %87, %88 : vector<2x128xf32>
      scf.yield %89 : vector<2x128xf32>
    }
    %c8_i32_12 = arith.constant 8 : i32
    %c0_13 = arith.constant 0 : index
    %c0_14 = arith.constant 0 : index
    %16 = vector.load %arg5[%c0_13, %c0_14] : memref<128x128xf32, #tpu.memory_space<vmem>>, vector<128x128xf32>
    %cst_15 = arith.constant dense<0.000000e+00> : vector<2x128xf32>
    %17 = tpu.matmul %15, %16, %cst_15 {dimension_numbers = #tpu.dot_dimension_numbers<[1], [0], [0], [1], [0, 0, 1, 1], [], []>} : vector<2x128xf32>, vector<128x128xf32>, vector<2x128xf32> -> vector<2x128xf32>
    %c0_16 = arith.constant 0 : index
    %c0_17 = arith.constant 0 : index
    %18 = vector.load %arg6[%c0_16, %c0_17] : memref<1x128xf32, #tpu.memory_space<vmem>>, vector<1x128xf32>
    %19 = vector.broadcast %18 : vector<1x128xf32> to vector<2x128xf32>
    %20 = arith.addf %17, %19 : vector<2x128xf32>
    %c0_18 = arith.constant 0 : index
    %c0_19 = arith.constant 0 : index
    %21 = vector.load %arg8[%c0_18, %c0_19] : memref<1x128xf32, #tpu.memory_space<vmem>>, vector<1x128xf32>
    %22 = vector.shape_cast %21 : vector<1x128xf32> to vector<1x128xf32>
    %23 = vector.broadcast %22 : vector<1x128xf32> to vector<2x128xf32>
    %c0_20 = arith.constant 0 : index
    %c0_21 = arith.constant 0 : index
    %24 = vector.load %arg10[%c0_20, %c0_21] : memref<1x128xf32, #tpu.memory_space<vmem>>, vector<1x128xf32>
    %25 = vector.shape_cast %24 : vector<1x128xf32> to vector<1x128xf32>
    %26 = vector.broadcast %25 : vector<1x128xf32> to vector<2x128xf32>
    %c0_22 = arith.constant 0 : index
    %c0_23 = arith.constant 0 : index
    %27 = vector.load %arg12[%c0_22, %c0_23] : memref<1x128xf32, #tpu.memory_space<vmem>>, vector<1x128xf32>
    %28 = vector.shape_cast %27 : vector<1x128xf32> to vector<1x128xf32>
    %29 = vector.broadcast %28 : vector<1x128xf32> to vector<2x128xf32>
    %c0_24 = arith.constant 0 : index
    %c0_25 = arith.constant 0 : index
    %30 = vector.load %arg14[%c0_24, %c0_25] : memref<1x128xf32, #tpu.memory_space<vmem>>, vector<1x128xf32>
    %31 = vector.shape_cast %30 : vector<1x128xf32> to vector<1x128xf32>
    %32 = vector.broadcast %31 : vector<1x128xf32> to vector<2x128xf32>
    %c0_26 = arith.constant 0 : index
    %c0_27 = arith.constant 0 : index
    %33 = vector.load %arg16[%c0_26, %c0_27] : memref<1x128xf32, #tpu.memory_space<vmem>>, vector<1x128xf32>
    %34 = vector.shape_cast %33 : vector<1x128xf32> to vector<1x128xf32>
    %35 = vector.broadcast %34 : vector<1x128xf32> to vector<2x128xf32>
    %c0_28 = arith.constant 0 : index
    %c0_29 = arith.constant 0 : index
    %c0_30 = arith.constant 0 : index
    %36 = vector.load %arg23[%c0_28, %c0_29, %c0_30] : memref<8x2x128xf32, #tpu.memory_space<vmem>>, vector<1x2x128xf32>
    %37 = vector.shape_cast %36 : vector<1x2x128xf32> to vector<2x128xf32>
    %38 = vector.shape_cast %20 : vector<2x128xf32> to vector<1x2x128xf32>
    tpu.vector_store %arg23[%c0_28, %c0_29, %c0_30], %38 {strides = array<i32>} : memref<8x2x128xf32, #tpu.memory_space<vmem>>, vector<1x2x128xf32>,
    %c1_i32_31 = arith.constant 1 : i32
    %c7_i32 = arith.constant 7 : i32
    %39 = arith.addi %c1_i32_31, %c7_i32 : i32
    %c1_i32_32 = arith.constant 1 : i32
    %40 = scf.for %arg24 = %c1_i32_31 to %39 step %c1_i32_32 iter_args(%arg25 = %20) -> (vector<2x128xf32>)  : i32 {
      %c0_51 = arith.constant 0 : index
      %c0_52 = arith.constant 0 : index
      %58 = vector.load %arg7[%c0_51, %c0_52] : memref<128x128xf32, #tpu.memory_space<vmem>>, vector<128x128xf32>
      %cst_53 = arith.constant dense<0.000000e+00> : vector<2x128xf32>
      %59 = tpu.matmul %arg25, %58, %cst_53 {dimension_numbers = #tpu.dot_dimension_numbers<[1], [0], [0], [1], [0, 0, 1, 1], [], []>} : vector<2x128xf32>, vector<128x128xf32>, vector<2x128xf32> -> vector<2x128xf32>
      %60 = arith.addf %59, %23 : vector<2x128xf32>
      %cst_54 = arith.constant 0.000000e+00 : f32
      %61 = vector.broadcast %cst_54 : f32 to vector<2x128xf32>
      %62 = arith.cmpf ogt, %60, %61 : vector<2x128xf32>
      %cst_55 = arith.constant 0.000000e+00 : f32
      %63 = vector.broadcast %cst_55 : f32 to vector<2x128xf32>
      %64 = arith.minimumf %60, %63 : vector<2x128xf32>
      %65 = math.exp %64 : vector<2x128xf32>
      %cst_56 = arith.constant 1.000000e+00 : f32
      %66 = vector.broadcast %cst_56 : f32 to vector<2x128xf32>
      %67 = arith.subf %65, %66 : vector<2x128xf32>
      %68 = arith.select %62, %60, %67 : vector<2x128xi1>, vector<2x128xf32>
      %c0_57 = arith.constant 0 : index
      %c0_58 = arith.constant 0 : index
      %69 = vector.load %arg9[%c0_57, %c0_58] : memref<128x128xf32, #tpu.memory_space<vmem>>, vector<128x128xf32>
      %cst_59 = arith.constant dense<0.000000e+00> : vector<2x128xf32>
      %70 = tpu.matmul %68, %69, %cst_59 {dimension_numbers = #tpu.dot_dimension_numbers<[1], [0], [0], [1], [0, 0, 1, 1], [], []>} : vector<2x128xf32>, vector<128x128xf32>, vector<2x128xf32> -> vector<2x128xf32>
      %71 = arith.addf %70, %26 : vector<2x128xf32>
      %cst_60 = arith.constant 0.000000e+00 : f32
      %72 = vector.broadcast %cst_60 : f32 to vector<2x128xf32>
      %73 = arith.cmpf ogt, %71, %72 : vector<2x128xf32>
      %cst_61 = arith.constant 0.000000e+00 : f32
      %74 = vector.broadcast %cst_61 : f32 to vector<2x128xf32>
      %75 = arith.minimumf %71, %74 : vector<2x128xf32>
      %76 = math.exp %75 : vector<2x128xf32>
      %cst_62 = arith.constant 1.000000e+00 : f32
      %77 = vector.broadcast %cst_62 : f32 to vector<2x128xf32>
      %78 = arith.subf %76, %77 : vector<2x128xf32>
      %79 = arith.select %73, %71, %78 : vector<2x128xi1>, vector<2x128xf32>
      %c0_63 = arith.constant 0 : index
      %c0_64 = arith.constant 0 : index
      %80 = vector.load %arg11[%c0_63, %c0_64] : memref<128x128xf32, #tpu.memory_space<vmem>>, vector<128x128xf32>
      %cst_65 = arith.constant dense<0.000000e+00> : vector<2x128xf32>
      %81 = tpu.matmul %79, %80, %cst_65 {dimension_numbers = #tpu.dot_dimension_numbers<[1], [0], [0], [1], [0, 0, 1, 1], [], []>} : vector<2x128xf32>, vector<128x128xf32>, vector<2x128xf32> -> vector<2x128xf32>
      %82 = arith.addf %81, %29 : vector<2x128xf32>
      %cst_66 = arith.constant 0.000000e+00 : f32
      %83 = vector.broadcast %cst_66 : f32 to vector<2x128xf32>
      %84 = arith.cmpf ogt, %82, %83 : vector<2x128xf32>
      %cst_67 = arith.constant 0.000000e+00 : f32
      %85 = vector.broadcast %cst_67 : f32 to vector<2x128xf32>
      %86 = arith.minimumf %82, %85 : vector<2x128xf32>
      %87 = math.exp %86 : vector<2x128xf32>
      %cst_68 = arith.constant 1.000000e+00 : f32
      %88 = vector.broadcast %cst_68 : f32 to vector<2x128xf32>
      %89 = arith.subf %87, %88 : vector<2x128xf32>
      %90 = arith.select %84, %82, %89 : vector<2x128xi1>, vector<2x128xf32>
      %c0_69 = arith.constant 0 : index
      %c0_70 = arith.constant 0 : index
      %91 = vector.load %arg13[%c0_69, %c0_70] : memref<128x128xf32, #tpu.memory_space<vmem>>, vector<128x128xf32>
      %cst_71 = arith.constant dense<0.000000e+00> : vector<2x128xf32>
      %92 = tpu.matmul %90, %91, %cst_71 {dimension_numbers = #tpu.dot_dimension_numbers<[1], [0], [0], [1], [0, 0, 1, 1], [], []>} : vector<2x128xf32>, vector<128x128xf32>, vector<2x128xf32> -> vector<2x128xf32>
      %93 = arith.addf %92, %32 : vector<2x128xf32>
      %cst_72 = arith.constant 0.000000e+00 : f32
      %94 = vector.broadcast %cst_72 : f32 to vector<2x128xf32>
      %95 = arith.cmpf ogt, %93, %94 : vector<2x128xf32>
      %cst_73 = arith.constant 0.000000e+00 : f32
      %96 = vector.broadcast %cst_73 : f32 to vector<2x128xf32>
      %97 = arith.minimumf %93, %96 : vector<2x128xf32>
      %98 = math.exp %97 : vector<2x128xf32>
      %cst_74 = arith.constant 1.000000e+00 : f32
      %99 = vector.broadcast %cst_74 : f32 to vector<2x128xf32>
      %100 = arith.subf %98, %99 : vector<2x128xf32>
      %101 = arith.select %95, %93, %100 : vector<2x128xi1>, vector<2x128xf32>
      %c0_75 = arith.constant 0 : index
      %c0_76 = arith.constant 0 : index
      %102 = vector.load %arg15[%c0_75, %c0_76] : memref<128x128xf32, #tpu.memory_space<vmem>>, vector<128x128xf32>
      %cst_77 = arith.constant dense<0.000000e+00> : vector<2x128xf32>
      %103 = tpu.matmul %101, %102, %cst_77 {dimension_numbers = #tpu.dot_dimension_numbers<[1], [0], [0], [1], [0, 0, 1, 1], [], []>} : vector<2x128xf32>, vector<128x128xf32>, vector<2x128xf32> -> vector<2x128xf32>
      %104 = arith.addf %103, %35 : vector<2x128xf32>
      %cst_78 = arith.constant 5.000000e-03 : f32
      %105 = vector.broadcast %cst_78 : f32 to vector<2x128xf32>
      %106 = arith.mulf %105, %104 : vector<2x128xf32>
      %107 = arith.addf %arg25, %106 : vector<2x128xf32>
      %c0_79 = arith.constant 0 : index
      %c0_80 = arith.constant 0 : index
      %108 = vector.load %arg7[%c0_79, %c0_80] : memref<128x128xf32, #tpu.memory_space<vmem>>, vector<128x128xf32>
      %cst_81 = arith.constant dense<0.000000e+00> : vector<2x128xf32>
      %109 = tpu.matmul %107, %108, %cst_81 {dimension_numbers = #tpu.dot_dimension_numbers<[1], [0], [0], [1], [0, 0, 1, 1], [], []>} : vector<2x128xf32>, vector<128x128xf32>, vector<2x128xf32> -> vector<2x128xf32>
      %110 = arith.addf %109, %23 : vector<2x128xf32>
      %cst_82 = arith.constant 0.000000e+00 : f32
      %111 = vector.broadcast %cst_82 : f32 to vector<2x128xf32>
      %112 = arith.cmpf ogt, %110, %111 : vector<2x128xf32>
      %cst_83 = arith.constant 0.000000e+00 : f32
      %113 = vector.broadcast %cst_83 : f32 to vector<2x128xf32>
      %114 = arith.minimumf %110, %113 : vector<2x128xf32>
      %115 = math.exp %114 : vector<2x128xf32>
      %cst_84 = arith.constant 1.000000e+00 : f32
      %116 = vector.broadcast %cst_84 : f32 to vector<2x128xf32>
      %117 = arith.subf %115, %116 : vector<2x128xf32>
      %118 = arith.select %112, %110, %117 : vector<2x128xi1>, vector<2x128xf32>
      %c0_85 = arith.constant 0 : index
      %c0_86 = arith.constant 0 : index
      %119 = vector.load %arg9[%c0_85, %c0_86] : memref<128x128xf32, #tpu.memory_space<vmem>>, vector<128x128xf32>
      %cst_87 = arith.constant dense<0.000000e+00> : vector<2x128xf32>
      %120 = tpu.matmul %118, %119, %cst_87 {dimension_numbers = #tpu.dot_dimension_numbers<[1], [0], [0], [1], [0, 0, 1, 1], [], []>} : vector<2x128xf32>, vector<128x128xf32>, vector<2x128xf32> -> vector<2x128xf32>
      %121 = arith.addf %120, %26 : vector<2x128xf32>
      %cst_88 = arith.constant 0.000000e+00 : f32
      %122 = vector.broadcast %cst_88 : f32 to vector<2x128xf32>
      %123 = arith.cmpf ogt, %121, %122 : vector<2x128xf32>
      %cst_89 = arith.constant 0.000000e+00 : f32
      %124 = vector.broadcast %cst_89 : f32 to vector<2x128xf32>
      %125 = arith.minimumf %121, %124 : vector<2x128xf32>
      %126 = math.exp %125 : vector<2x128xf32>
      %cst_90 = arith.constant 1.000000e+00 : f32
      %127 = vector.broadcast %cst_90 : f32 to vector<2x128xf32>
      %128 = arith.subf %126, %127 : vector<2x128xf32>
      %129 = arith.select %123, %121, %128 : vector<2x128xi1>, vector<2x128xf32>
      %c0_91 = arith.constant 0 : index
      %c0_92 = arith.constant 0 : index
      %130 = vector.load %arg11[%c0_91, %c0_92] : memref<128x128xf32, #tpu.memory_space<vmem>>, vector<128x128xf32>
      %cst_93 = arith.constant dense<0.000000e+00> : vector<2x128xf32>
      %131 = tpu.matmul %129, %130, %cst_93 {dimension_numbers = #tpu.dot_dimension_numbers<[1], [0], [0], [1], [0, 0, 1, 1], [], []>} : vector<2x128xf32>, vector<128x128xf32>, vector<2x128xf32> -> vector<2x128xf32>
      %132 = arith.addf %131, %29 : vector<2x128xf32>
      %cst_94 = arith.constant 0.000000e+00 : f32
      %133 = vector.broadcast %cst_94 : f32 to vector<2x128xf32>
      %134 = arith.cmpf ogt, %132, %133 : vector<2x128xf32>
      %cst_95 = arith.constant 0.000000e+00 : f32
      %135 = vector.broadcast %cst_95 : f32 to vector<2x128xf32>
      %136 = arith.minimumf %132, %135 : vector<2x128xf32>
      %137 = math.exp %136 : vector<2x128xf32>
      %cst_96 = arith.constant 1.000000e+00 : f32
      %138 = vector.broadcast %cst_96 : f32 to vector<2x128xf32>
      %139 = arith.subf %137, %138 : vector<2x128xf32>
      %140 = arith.select %134, %132, %139 : vector<2x128xi1>, vector<2x128xf32>
      %c0_97 = arith.constant 0 : index
      %c0_98 = arith.constant 0 : index
      %141 = vector.load %arg13[%c0_97, %c0_98] : memref<128x128xf32, #tpu.memory_space<vmem>>, vector<128x128xf32>
      %cst_99 = arith.constant dense<0.000000e+00> : vector<2x128xf32>
      %142 = tpu.matmul %140, %141, %cst_99 {dimension_numbers = #tpu.dot_dimension_numbers<[1], [0], [0], [1], [0, 0, 1, 1], [], []>} : vector<2x128xf32>, vector<128x128xf32>, vector<2x128xf32> -> vector<2x128xf32>
      %143 = arith.addf %142, %32 : vector<2x128xf32>
      %cst_100 = arith.constant 0.000000e+00 : f32
      %144 = vector.broadcast %cst_100 : f32 to vector<2x128xf32>
      %145 = arith.cmpf ogt, %143, %144 : vector<2x128xf32>
      %cst_101 = arith.constant 0.000000e+00 : f32
      %146 = vector.broadcast %cst_101 : f32 to vector<2x128xf32>
      %147 = arith.minimumf %143, %146 : vector<2x128xf32>
      %148 = math.exp %147 : vector<2x128xf32>
      %cst_102 = arith.constant 1.000000e+00 : f32
      %149 = vector.broadcast %cst_102 : f32 to vector<2x128xf32>
      %150 = arith.subf %148, %149 : vector<2x128xf32>
      %151 = arith.select %145, %143, %150 : vector<2x128xi1>, vector<2x128xf32>
      %c0_103 = arith.constant 0 : index
      %c0_104 = arith.constant 0 : index
      %152 = vector.load %arg15[%c0_103, %c0_104] : memref<128x128xf32, #tpu.memory_space<vmem>>, vector<128x128xf32>
      %cst_105 = arith.constant dense<0.000000e+00> : vector<2x128xf32>
      %153 = tpu.matmul %151, %152, %cst_105 {dimension_numbers = #tpu.dot_dimension_numbers<[1], [0], [0], [1], [0, 0, 1, 1], [], []>} : vector<2x128xf32>, vector<128x128xf32>, vector<2x128xf32> -> vector<2x128xf32>
      %154 = arith.addf %153, %35 : vector<2x128xf32>
      %cst_106 = arith.constant 5.000000e-03 : f32
      %155 = vector.broadcast %cst_106 : f32 to vector<2x128xf32>
      %156 = arith.mulf %155, %154 : vector<2x128xf32>
      %157 = arith.addf %arg25, %156 : vector<2x128xf32>
      %c0_107 = arith.constant 0 : index
      %c0_108 = arith.constant 0 : index
      %158 = vector.load %arg7[%c0_107, %c0_108] : memref<128x128xf32, #tpu.memory_space<vmem>>, vector<128x128xf32>
      %cst_109 = arith.constant dense<0.000000e+00> : vector<2x128xf32>
      %159 = tpu.matmul %157, %158, %cst_109 {dimension_numbers = #tpu.dot_dimension_numbers<[1], [0], [0], [1], [0, 0, 1, 1], [], []>} : vector<2x128xf32>, vector<128x128xf32>, vector<2x128xf32> -> vector<2x128xf32>
      %160 = arith.addf %159, %23 : vector<2x128xf32>
      %cst_110 = arith.constant 0.000000e+00 : f32
      %161 = vector.broadcast %cst_110 : f32 to vector<2x128xf32>
      %162 = arith.cmpf ogt, %160, %161 : vector<2x128xf32>
      %cst_111 = arith.constant 0.000000e+00 : f32
      %163 = vector.broadcast %cst_111 : f32 to vector<2x128xf32>
      %164 = arith.minimumf %160, %163 : vector<2x128xf32>
      %165 = math.exp %164 : vector<2x128xf32>
      %cst_112 = arith.constant 1.000000e+00 : f32
      %166 = vector.broadcast %cst_112 : f32 to vector<2x128xf32>
      %167 = arith.subf %165, %166 : vector<2x128xf32>
      %168 = arith.select %162, %160, %167 : vector<2x128xi1>, vector<2x128xf32>
      %c0_113 = arith.constant 0 : index
      %c0_114 = arith.constant 0 : index
      %169 = vector.load %arg9[%c0_113, %c0_114] : memref<128x128xf32, #tpu.memory_space<vmem>>, vector<128x128xf32>
      %cst_115 = arith.constant dense<0.000000e+00> : vector<2x128xf32>
      %170 = tpu.matmul %168, %169, %cst_115 {dimension_numbers = #tpu.dot_dimension_numbers<[1], [0], [0], [1], [0, 0, 1, 1], [], []>} : vector<2x128xf32>, vector<128x128xf32>, vector<2x128xf32> -> vector<2x128xf32>
      %171 = arith.addf %170, %26 : vector<2x128xf32>
      %cst_116 = arith.constant 0.000000e+00 : f32
      %172 = vector.broadcast %cst_116 : f32 to vector<2x128xf32>
      %173 = arith.cmpf ogt, %171, %172 : vector<2x128xf32>
      %cst_117 = arith.constant 0.000000e+00 : f32
      %174 = vector.broadcast %cst_117 : f32 to vector<2x128xf32>
      %175 = arith.minimumf %171, %174 : vector<2x128xf32>
      %176 = math.exp %175 : vector<2x128xf32>
      %cst_118 = arith.constant 1.000000e+00 : f32
      %177 = vector.broadcast %cst_118 : f32 to vector<2x128xf32>
      %178 = arith.subf %176, %177 : vector<2x128xf32>
      %179 = arith.select %173, %171, %178 : vector<2x128xi1>, vector<2x128xf32>
      %c0_119 = arith.constant 0 : index
      %c0_120 = arith.constant 0 : index
      %180 = vector.load %arg11[%c0_119, %c0_120] : memref<128x128xf32, #tpu.memory_space<vmem>>, vector<128x128xf32>
      %cst_121 = arith.constant dense<0.000000e+00> : vector<2x128xf32>
      %181 = tpu.matmul %179, %180, %cst_121 {dimension_numbers = #tpu.dot_dimension_numbers<[1], [0], [0], [1], [0, 0, 1, 1], [], []>} : vector<2x128xf32>, vector<128x128xf32>, vector<2x128xf32> -> vector<2x128xf32>
      %182 = arith.addf %181, %29 : vector<2x128xf32>
      %cst_122 = arith.constant 0.000000e+00 : f32
      %183 = vector.broadcast %cst_122 : f32 to vector<2x128xf32>
      %184 = arith.cmpf ogt, %182, %183 : vector<2x128xf32>
      %cst_123 = arith.constant 0.000000e+00 : f32
      %185 = vector.broadcast %cst_123 : f32 to vector<2x128xf32>
      %186 = arith.minimumf %182, %185 : vector<2x128xf32>
      %187 = math.exp %186 : vector<2x128xf32>
      %cst_124 = arith.constant 1.000000e+00 : f32
      %188 = vector.broadcast %cst_124 : f32 to vector<2x128xf32>
      %189 = arith.subf %187, %188 : vector<2x128xf32>
      %190 = arith.select %184, %182, %189 : vector<2x128xi1>, vector<2x128xf32>
      %c0_125 = arith.constant 0 : index
      %c0_126 = arith.constant 0 : index
      %191 = vector.load %arg13[%c0_125, %c0_126] : memref<128x128xf32, #tpu.memory_space<vmem>>, vector<128x128xf32>
      %cst_127 = arith.constant dense<0.000000e+00> : vector<2x128xf32>
      %192 = tpu.matmul %190, %191, %cst_127 {dimension_numbers = #tpu.dot_dimension_numbers<[1], [0], [0], [1], [0, 0, 1, 1], [], []>} : vector<2x128xf32>, vector<128x128xf32>, vector<2x128xf32> -> vector<2x128xf32>
      %193 = arith.addf %192, %32 : vector<2x128xf32>
      %cst_128 = arith.constant 0.000000e+00 : f32
      %194 = vector.broadcast %cst_128 : f32 to vector<2x128xf32>
      %195 = arith.cmpf ogt, %193, %194 : vector<2x128xf32>
      %cst_129 = arith.constant 0.000000e+00 : f32
      %196 = vector.broadcast %cst_129 : f32 to vector<2x128xf32>
      %197 = arith.minimumf %193, %196 : vector<2x128xf32>
      %198 = math.exp %197 : vector<2x128xf32>
      %cst_130 = arith.constant 1.000000e+00 : f32
      %199 = vector.broadcast %cst_130 : f32 to vector<2x128xf32>
      %200 = arith.subf %198, %199 : vector<2x128xf32>
      %201 = arith.select %195, %193, %200 : vector<2x128xi1>, vector<2x128xf32>
      %c0_131 = arith.constant 0 : index
      %c0_132 = arith.constant 0 : index
      %202 = vector.load %arg15[%c0_131, %c0_132] : memref<128x128xf32, #tpu.memory_space<vmem>>, vector<128x128xf32>
      %cst_133 = arith.constant dense<0.000000e+00> : vector<2x128xf32>
      %203 = tpu.matmul %201, %202, %cst_133 {dimension_numbers = #tpu.dot_dimension_numbers<[1], [0], [0], [1], [0, 0, 1, 1], [], []>} : vector<2x128xf32>, vector<128x128xf32>, vector<2x128xf32> -> vector<2x128xf32>
      %204 = arith.addf %203, %35 : vector<2x128xf32>
      %cst_134 = arith.constant 0.00999999977 : f32
      %205 = vector.broadcast %cst_134 : f32 to vector<2x128xf32>
      %206 = arith.mulf %205, %204 : vector<2x128xf32>
      %207 = arith.addf %arg25, %206 : vector<2x128xf32>
      %c0_135 = arith.constant 0 : index
      %c0_136 = arith.constant 0 : index
      %208 = vector.load %arg7[%c0_135, %c0_136] : memref<128x128xf32, #tpu.memory_space<vmem>>, vector<128x128xf32>
      %cst_137 = arith.constant dense<0.000000e+00> : vector<2x128xf32>
      %209 = tpu.matmul %207, %208, %cst_137 {dimension_numbers = #tpu.dot_dimension_numbers<[1], [0], [0], [1], [0, 0, 1, 1], [], []>} : vector<2x128xf32>, vector<128x128xf32>, vector<2x128xf32> -> vector<2x128xf32>
      %210 = arith.addf %209, %23 : vector<2x128xf32>
      %cst_138 = arith.constant 0.000000e+00 : f32
      %211 = vector.broadcast %cst_138 : f32 to vector<2x128xf32>
      %212 = arith.cmpf ogt, %210, %211 : vector<2x128xf32>
      %cst_139 = arith.constant 0.000000e+00 : f32
      %213 = vector.broadcast %cst_139 : f32 to vector<2x128xf32>
      %214 = arith.minimumf %210, %213 : vector<2x128xf32>
      %215 = math.exp %214 : vector<2x128xf32>
      %cst_140 = arith.constant 1.000000e+00 : f32
      %216 = vector.broadcast %cst_140 : f32 to vector<2x128xf32>
      %217 = arith.subf %215, %216 : vector<2x128xf32>
      %218 = arith.select %212, %210, %217 : vector<2x128xi1>, vector<2x128xf32>
      %c0_141 = arith.constant 0 : index
      %c0_142 = arith.constant 0 : index
      %219 = vector.load %arg9[%c0_141, %c0_142] : memref<128x128xf32, #tpu.memory_space<vmem>>, vector<128x128xf32>
      %cst_143 = arith.constant dense<0.000000e+00> : vector<2x128xf32>
      %220 = tpu.matmul %218, %219, %cst_143 {dimension_numbers = #tpu.dot_dimension_numbers<[1], [0], [0], [1], [0, 0, 1, 1], [], []>} : vector<2x128xf32>, vector<128x128xf32>, vector<2x128xf32> -> vector<2x128xf32>
      %221 = arith.addf %220, %26 : vector<2x128xf32>
      %cst_144 = arith.constant 0.000000e+00 : f32
      %222 = vector.broadcast %cst_144 : f32 to vector<2x128xf32>
      %223 = arith.cmpf ogt, %221, %222 : vector<2x128xf32>
      %cst_145 = arith.constant 0.000000e+00 : f32
      %224 = vector.broadcast %cst_145 : f32 to vector<2x128xf32>
      %225 = arith.minimumf %221, %224 : vector<2x128xf32>
      %226 = math.exp %225 : vector<2x128xf32>
      %cst_146 = arith.constant 1.000000e+00 : f32
      %227 = vector.broadcast %cst_146 : f32 to vector<2x128xf32>
      %228 = arith.subf %226, %227 : vector<2x128xf32>
      %229 = arith.select %223, %221, %228 : vector<2x128xi1>, vector<2x128xf32>
      %c0_147 = arith.constant 0 : index
      %c0_148 = arith.constant 0 : index
      %230 = vector.load %arg11[%c0_147, %c0_148] : memref<128x128xf32, #tpu.memory_space<vmem>>, vector<128x128xf32>
      %cst_149 = arith.constant dense<0.000000e+00> : vector<2x128xf32>
      %231 = tpu.matmul %229, %230, %cst_149 {dimension_numbers = #tpu.dot_dimension_numbers<[1], [0], [0], [1], [0, 0, 1, 1], [], []>} : vector<2x128xf32>, vector<128x128xf32>, vector<2x128xf32> -> vector<2x128xf32>
      %232 = arith.addf %231, %29 : vector<2x128xf32>
      %cst_150 = arith.constant 0.000000e+00 : f32
      %233 = vector.broadcast %cst_150 : f32 to vector<2x128xf32>
      %234 = arith.cmpf ogt, %232, %233 : vector<2x128xf32>
      %cst_151 = arith.constant 0.000000e+00 : f32
      %235 = vector.broadcast %cst_151 : f32 to vector<2x128xf32>
      %236 = arith.minimumf %232, %235 : vector<2x128xf32>
      %237 = math.exp %236 : vector<2x128xf32>
      %cst_152 = arith.constant 1.000000e+00 : f32
      %238 = vector.broadcast %cst_152 : f32 to vector<2x128xf32>
      %239 = arith.subf %237, %238 : vector<2x128xf32>
      %240 = arith.select %234, %232, %239 : vector<2x128xi1>, vector<2x128xf32>
      %c0_153 = arith.constant 0 : index
      %c0_154 = arith.constant 0 : index
      %241 = vector.load %arg13[%c0_153, %c0_154] : memref<128x128xf32, #tpu.memory_space<vmem>>, vector<128x128xf32>
      %cst_155 = arith.constant dense<0.000000e+00> : vector<2x128xf32>
      %242 = tpu.matmul %240, %241, %cst_155 {dimension_numbers = #tpu.dot_dimension_numbers<[1], [0], [0], [1], [0, 0, 1, 1], [], []>} : vector<2x128xf32>, vector<128x128xf32>, vector<2x128xf32> -> vector<2x128xf32>
      %243 = arith.addf %242, %32 : vector<2x128xf32>
      %cst_156 = arith.constant 0.000000e+00 : f32
      %244 = vector.broadcast %cst_156 : f32 to vector<2x128xf32>
      %245 = arith.cmpf ogt, %243, %244 : vector<2x128xf32>
      %cst_157 = arith.constant 0.000000e+00 : f32
      %246 = vector.broadcast %cst_157 : f32 to vector<2x128xf32>
      %247 = arith.minimumf %243, %246 : vector<2x128xf32>
      %248 = math.exp %247 : vector<2x128xf32>
      %cst_158 = arith.constant 1.000000e+00 : f32
      %249 = vector.broadcast %cst_158 : f32 to vector<2x128xf32>
      %250 = arith.subf %248, %249 : vector<2x128xf32>
      %251 = arith.select %245, %243, %250 : vector<2x128xi1>, vector<2x128xf32>
      %c0_159 = arith.constant 0 : index
      %c0_160 = arith.constant 0 : index
      %252 = vector.load %arg15[%c0_159, %c0_160] : memref<128x128xf32, #tpu.memory_space<vmem>>, vector<128x128xf32>
      %cst_161 = arith.constant dense<0.000000e+00> : vector<2x128xf32>
      %253 = tpu.matmul %251, %252, %cst_161 {dimension_numbers = #tpu.dot_dimension_numbers<[1], [0], [0], [1], [0, 0, 1, 1], [], []>} : vector<2x128xf32>, vector<128x128xf32>, vector<2x128xf32> -> vector<2x128xf32>
      %254 = arith.addf %253, %35 : vector<2x128xf32>
      %cst_162 = arith.constant 2.000000e+00 : f32
      %255 = vector.broadcast %cst_162 : f32 to vector<2x128xf32>
      %256 = arith.mulf %255, %154 : vector<2x128xf32>
      %257 = arith.addf %104, %256 : vector<2x128xf32>
      %cst_163 = arith.constant 2.000000e+00 : f32
      %258 = vector.broadcast %cst_163 : f32 to vector<2x128xf32>
      %259 = arith.mulf %258, %204 : vector<2x128xf32>
      %260 = arith.addf %257, %259 : vector<2x128xf32>
      %261 = arith.addf %260, %254 : vector<2x128xf32>
      %cst_164 = arith.constant 0.00166666671 : f32
      %262 = vector.broadcast %cst_164 : f32 to vector<2x128xf32>
      %263 = arith.mulf %262, %261 : vector<2x128xf32>
      %264 = arith.addf %arg25, %263 : vector<2x128xf32>
      %265 = arith.index_cast %arg24 : i32 to index
      %c0_165 = arith.constant 0 : index
      %c0_166 = arith.constant 0 : index
      %266 = vector.load %arg23[%265, %c0_165, %c0_166] : memref<8x2x128xf32, #tpu.memory_space<vmem>>, vector<1x2x128xf32>
      %267 = vector.shape_cast %266 : vector<1x2x128xf32> to vector<2x128xf32>
      %268 = vector.shape_cast %264 : vector<2x128xf32> to vector<1x2x128xf32>
      tpu.vector_store %arg23[%265, %c0_165, %c0_166], %268 {strides = array<i32>} : memref<8x2x128xf32, #tpu.memory_space<vmem>>, vector<1x2x128xf32>,
      scf.yield %264 : vector<2x128xf32>
    }
    %c7_i32_33 = arith.constant 7 : i32
    %c0_34 = arith.constant 0 : index
    %c0_35 = arith.constant 0 : index
    %c0_36 = arith.constant 0 : index
    %41 = vector.load %arg23[%c0_34, %c0_35, %c0_36] : memref<8x2x128xf32, #tpu.memory_space<vmem>>, vector<8x2x128xf32>
    %42 = vector.shape_cast %41 : vector<8x2x128xf32> to vector<16x128xf32>
    %c0_37 = arith.constant 0 : index
    %c0_38 = arith.constant 0 : index
    %43 = vector.load %arg17[%c0_37, %c0_38] : memref<128x128xf32, #tpu.memory_space<vmem>>, vector<128x128xf32>
    %cst_39 = arith.constant dense<0.000000e+00> : vector<16x128xf32>
    %44 = tpu.matmul %42, %43, %cst_39 {dimension_numbers = #tpu.dot_dimension_numbers<[1], [0], [0], [1], [0, 0, 1, 1], [], []>} : vector<16x128xf32>, vector<128x128xf32>, vector<16x128xf32> -> vector<16x128xf32>
    %c0_40 = arith.constant 0 : index
    %c0_41 = arith.constant 0 : index
    %45 = vector.load %arg18[%c0_40, %c0_41] : memref<1x128xf32, #tpu.memory_space<vmem>>, vector<1x128xf32>
    %46 = vector.broadcast %45 : vector<1x128xf32> to vector<16x128xf32>
    %47 = arith.addf %44, %46 : vector<16x128xf32>
    %cst_42 = arith.constant 0.000000e+00 : f32
    %48 = vector.broadcast %cst_42 : f32 to vector<16x128xf32>
    %49 = arith.maximumf %47, %48 : vector<16x128xf32>
    %c0_43 = arith.constant 0 : index
    %c0_44 = arith.constant 0 : index
    %50 = vector.load %arg19[%c0_43, %c0_44] : memref<128x128xf32, #tpu.memory_space<vmem>>, vector<128x128xf32>
    %cst_45 = arith.constant dense<0.000000e+00> : vector<16x128xf32>
    %51 = tpu.matmul %49, %50, %cst_45 {dimension_numbers = #tpu.dot_dimension_numbers<[1], [0], [0], [1], [0, 0, 1, 1], [], []>} : vector<16x128xf32>, vector<128x128xf32>, vector<16x128xf32> -> vector<16x128xf32>
    %c0_46 = arith.constant 0 : index
    %c0_47 = arith.constant 0 : index
    %52 = vector.load %arg20[%c0_46, %c0_47] : memref<1x128xf32, #tpu.memory_space<vmem>>, vector<1x128xf32>
    %53 = vector.broadcast %52 : vector<1x128xf32> to vector<16x128xf32>
    %54 = arith.addf %51, %53 : vector<16x128xf32>
    %55 = vector.extract_strided_slice %54 {offsets = [0, 0], sizes = [16, 2], strides = [1, 1]} : vector<16x128xf32> to vector<16x2xf32>
    %56 = vector.shape_cast %55 : vector<16x2xf32> to vector<8x2x2xf32>
    %c0_48 = arith.constant 0 : index
    %c0_49 = arith.constant 0 : index
    %c0_50 = arith.constant 0 : index
    %57 = vector.load %arg21[%c0_48, %c0_49, %c0_50] : memref<8x2x2xf32, #tpu.memory_space<vmem>>, vector<8x2x2xf32>
    tpu.vector_store %arg21[%c0_48, %c0_49, %c0_50], %56 {strides = array<i32>} : memref<8x2x2xf32, #tpu.memory_space<vmem>>, vector<8x2x2xf32>,
    return
  }
}

</mosaic_0001>

<bundles_post_ra>
// kernel: latent_ode_forward.1
= control target key start
LH: loop header
LB: loop body
LE: loop exit
PB: predicated region body
PF: predicated region fallthrough
CT: control target
= control target key end

     0   :  { %s6037_s0 = inlined_call_operand.vmem [shape: f32[8,2,2], index: 0, kind: input, shape index: {}]   ;;  %s6038_s1 = inlined_call_operand.vmem [shape: f32[2,384], index: 1, kind: input, shape index: {}]   ;;  %s6039_s2 = inlined_call_operand.hbm [shape: f32[128,384], index: 2, kind: input, shape index: {}]   ;;  %s6040_s3 = inlined_call_operand.vmem [shape: f32[1,384], index: 3, kind: input, shape index: {}]   ;;  %s6041_s4 = inlined_call_operand.vmem [shape: f32[1,384], index: 4, kind: input, shape index: {}]   ;;  %s6042_s5 = inlined_call_operand.hbm [shape: f32[128,128], index: 5, kind: input, shape index: {}]   ;;  %s6043_s6 = inlined_call_operand.vmem [shape: f32[1,128], index: 6, kind: input, shape index: {}]   ;;  %s6044_s7 = inlined_call_operand.hbm [shape: f32[128,128], index: 7, kind: input, shape index: {}]   ;;  %s6045_s8 = inlined_call_operand.vmem [shape: f32[1,128], index: 8, kind: input, shape index: {}]   ;;  %s6046_s9 = inlined_call_operand.hbm [shape: f32[128,128], index: 9, kind: input, shape index: {}]   ;;  %s6047_s10 = inlined_call_operand.vmem [shape: f32[1,128], index: 10, kind: input, shape index: {}]   ;;  %s6048_s11 = inlined_call_operand.hbm [shape: f32[128,128], index: 11, kind: input, shape index: {}]   ;;  %s6049_s12 = inlined_call_operand.vmem [shape: f32[1,128], index: 12, kind: input, shape index: {}]   ;;  %s6050_s13 = inlined_call_operand.hbm [shape: f32[128,128], index: 13, kind: input, shape index: {}]   ;;  %s6051_s14 = inlined_call_operand.vmem [shape: f32[1,128], index: 14, kind: input, shape index: {}]   ;;  %s6052_s15 = inlined_call_operand.hbm [shape: f32[128,128], index: 15, kind: input, shape index: {}]   ;;  %s6053_s16 = inlined_call_operand.vmem [shape: f32[1,128], index: 16, kind: input, shape index: {}]   ;;  %s6054_s17 = inlined_call_operand.hbm [shape: f32[128,128], index: 17, kind: input, shape index: {}]   ;;  %s6055_s18 = inlined_call_operand.vmem [shape: f32[1,128], index: 18, kind: input, shape index: {}]   ;;  %s6056_s19 = inlined_call_operand.hbm [shape: f32[128,128], index: 19, kind: input, shape index: {}]   ;;  %s6057_s20 = inlined_call_operand.vmem [shape: f32[1,128], index: 20, kind: input, shape index: {}]   ;;  %s6058_s21 = inlined_call_operand.vmem [shape: f32[8,2,2], index: 21, kind: output, shape index: {}]  }
   0x1   :  { %6063 = sst [smem:[#allocation23_spill]] %s6037_s0 }
   0x2   :  { %6064 = sst [smem:[#allocation24_spill]] %s6038_s1 }
   0x3   :  { %6065 = sst [smem:[#allocation25_spill]] %s6039_s2 }
   0x4   :  { %6066 = sst [smem:[#allocation26_spill]] %s6040_s3 }
   0x5   :  { %6067 = sst [smem:[#allocation27_spill]] %s6041_s4 }
   0x6   :  { %6068 = sst [smem:[#allocation28_spill]] %s6042_s5 }
   0x7   :  { %6069 = sst [smem:[#allocation29_spill]] %s6057_s20 }
   0x8   :  { %6070 = sst [smem:[#allocation30_spill]] %s6058_s21 }
   0x9   :  { %26 = vsyncpa [#allocation5], 0 }
   0xa   :  { %27 = vsyncpa [#allocation7], 0 }
   0xb   :  { %28 = vsyncpa [#allocation10], 0 }
   0xc   :  { %29 = vsyncpa [#allocation13], 0 }
   0xd   :  { %30 = vsyncpa [#allocation16], 0  ;;  %s5112_s2 = smov [#allocation6]   ;;  %s6071_s3 = sld [smem:[#allocation28_spill]] }
   0xe   :  { %s56_s25 = sshll.u32 %s5112_s2, 4  ;;  %s57_s25 = int_to_ptr.vmem [resolvable:$true] %s56_s25 }
  0x13   :  { %s4872_s28 = scalar_lea.hbm %s6071_s3, 2048 }
  0x14   :  { %p4873_p0 = scmp.ne.s32.totalorder %s6071_s3, %s4872_s28  ;;  %p4876_p1 = scmp.lt.u32.totalorder %s4872_s28, %s6071_s3 }
  0x16   :  { %p4878_p2 = pnand %p4876_p1, %p4873_p0 }
  0x18   :  { %4881 = shalt.err (!%p4878_p2)
}
  0x19   :  { %s4882_s5 = scalar_lea.vmem %s57_s25, 2048  ;;  %p4887_p4 = scmp.lt.s32.totalorder %s57_s25, %s57_s25 }
  0x1a   :  { %p4883_p3 = scmp.ne.s32.totalorder %s57_s25, %s4882_s5  ;;  %p4888_p5 = scmp.lt.s32.totalorder %s4882_s5, %s4882_s5 }
  0x1c   :  { %p4889_p6 = por %p4888_p5, %p4887_p4 }
  0x1e   :  { %p4890_p7 = pnand %p4889_p6, %p4883_p3 }
  0x20   :  { %4893 = shalt.err (!%p4890_p7)
}
  0x21   :  { %s5113_s22 = smov 128   ;;  %s5114_s23 = smov 8  }
  0x22   :  { %62 = dma.hbm_to_vmem [thread:$0]  %s6071_s3, 2048, %s57_s25, [#allocation7], %s5113_s22, %s5113_s22, %s5114_s23  }
  0x23   :  { %s5115_s2 = smov [#allocation9]   ;;  %s5116_s27 = smov [#allocation12]  }
  0x24   :  { %s84_s26 = sshll.u32 %s5115_s2, 4  ;;  %s112_s28 = sshll.u32 %s5116_s27, 4  ;;  %s85_s26 = int_to_ptr.vmem [resolvable:$true] %s84_s26  ;;  %s113_s28 = int_to_ptr.vmem [resolvable:$true] %s112_s28 }
  0x25   :  { %s4894_s4 = scalar_lea.hbm %s6046_s9, 2048 }
  0x26   :  { %p4895_p8 = scmp.ne.s32.totalorder %s6046_s9, %s4894_s4  ;;  %p4898_p9 = scmp.lt.u32.totalorder %s4894_s4, %s6046_s9 }
  0x28   :  { %p4900_p10 = pnand %p4898_p9, %p4895_p8 }
  0x2a   :  { %4903 = shalt.err (!%p4900_p10)
}
  0x2b   :  { %s4904_s25 = scalar_lea.vmem %s85_s26, 2048  ;;  %p4909_p12 = scmp.lt.s32.totalorder %s85_s26, %s85_s26 }
  0x2c   :  { %p4905_p11 = scmp.ne.s32.totalorder %s85_s26, %s4904_s25  ;;  %p4910_p13 = scmp.lt.s32.totalorder %s4904_s25, %s4904_s25 }
  0x2e   :  { %p4911_p0 = por %p4910_p13, %p4909_p12 }
  0x30   :  { %p4912_p1 = pnand %p4911_p0, %p4905_p11 }
  0x32   :  { %4915 = shalt.err (!%p4912_p1)
}
  0x33   :  { %90 = dma.hbm_to_vmem [thread:$0]  %s6046_s9, 2048, %s85_s26, [#allocation10], %s5113_s22, %s5113_s22, %s5114_s23  }
  0x34   :  { %s4916_s21 = scalar_lea.hbm %s6050_s13, 2048 }
  0x35   :  { %p4917_p2 = scmp.ne.s32.totalorder %s6050_s13, %s4916_s21  ;;  %p4920_p3 = scmp.lt.u32.totalorder %s4916_s21, %s6050_s13 }
  0x37   :  { %p4922_p4 = pnand %p4920_p3, %p4917_p2 }
  0x39   :  { %4925 = shalt.err (!%p4922_p4)
}
  0x3a   :  { %s4926_s4 = scalar_lea.vmem %s113_s28, 2048  ;;  %p4931_p6 = scmp.lt.s32.totalorder %s113_s28, %s113_s28 }
  0x3b   :  { %p4927_p5 = scmp.ne.s32.totalorder %s113_s28, %s4926_s4  ;;  %p4932_p7 = scmp.lt.s32.totalorder %s4926_s4, %s4926_s4 }
  0x3d   :  { %p4933_p8 = por %p4932_p7, %p4931_p6 }
  0x3f   :  { %p4934_p9 = pnand %p4933_p8, %p4927_p5 }
  0x41   :  { %4937 = shalt.err (!%p4934_p9)
}
  0x42   :  { %118 = dma.hbm_to_vmem [thread:$0]  %s6050_s13, 2048, %s113_s28, [#allocation13], %s5113_s22, %s5113_s22, %s5114_s23  }
  0x43   :  { %s5117_s30 = smov [#allocation15]   ;;  %s5118_s25 = smov [#allocation4]  }
  0x44   :  { %s140_s5 = sshll.u32 %s5117_s30, 4  ;;  %s40_s3 = sshll.u32 %s5118_s25, 4  ;;  %s141_s5 = int_to_ptr.vmem [resolvable:$true] %s140_s5  ;;  %s41_s3 = int_to_ptr.vmem [resolvable:$true] %s40_s3 }
  0x45   :  { %s4938_s20 = scalar_lea.hbm %s6054_s17, 2048 }
  0x46   :  { %p4939_p10 = scmp.ne.s32.totalorder %s6054_s17, %s4938_s20  ;;  %p4942_p11 = scmp.lt.u32.totalorder %s4938_s20, %s6054_s17 }
  0x48   :  { %p4944_p12 = pnand %p4942_p11, %p4939_p10 }
  0x4a   :  { %4947 = shalt.err (!%p4944_p12)
}
  0x4b   :  { %s4948_s13 = scalar_lea.vmem %s141_s5, 2048  ;;  %p4953_p0 = scmp.lt.s32.totalorder %s141_s5, %s141_s5 }
  0x4c   :  { %p4949_p13 = scmp.ne.s32.totalorder %s141_s5, %s4948_s13  ;;  %p4954_p1 = scmp.lt.s32.totalorder %s4948_s13, %s4948_s13 }
  0x4e   :  { %p4955_p2 = por %p4954_p1, %p4953_p0 }
  0x50   :  { %p4956_p3 = pnand %p4955_p2, %p4949_p13 }
  0x52   :  { %4959 = shalt.err (!%p4956_p3)
}
  0x53   :  { %146 = dma.hbm_to_vmem [thread:$0]  %s6054_s17, 2048, %s141_s5, [#allocation16], %s5113_s22, %s5113_s22, %s5114_s23  }
  0x54   :  { %s6072_s26 = sld [smem:[#allocation25_spill]] }
  0x5a   :  { %s4960_s30 = scalar_lea.hbm %s6072_s26, 6144 }
  0x5b   :  { %p4961_p4 = scmp.ne.s32.totalorder %s6072_s26, %s4960_s30  ;;  %p4964_p5 = scmp.lt.u32.totalorder %s4960_s30, %s6072_s26 }
  0x5d   :  { %p4966_p6 = pnand %p4964_p5, %p4961_p4 }
  0x5f   :  { %4969 = shalt.err (!%p4966_p6)
}
  0x60   :  { %s4970_s21 = scalar_lea.vmem %s41_s3, 6144  ;;  %p4975_p8 = scmp.lt.s32.totalorder %s41_s3, %s41_s3 }
  0x61   :  { %p4971_p7 = scmp.ne.s32.totalorder %s41_s3, %s4970_s21  ;;  %p4976_p9 = scmp.lt.s32.totalorder %s4970_s21, %s4970_s21 }
  0x63   :  { %p4977_p10 = por %p4976_p9, %p4975_p8 }
  0x65   :  { %p4978_p11 = pnand %p4977_p10, %p4971_p7 }
  0x67   :  { %4981 = shalt.err (!%p4978_p11)
}
  0x68   :  { %s5119_s17 = smov 384   ;;  %s5120_s5 = smov 24  }
  0x69   :  { %46 = dma.hbm_to_vmem [thread:$0]  %s6072_s26, 6144, %s41_s3, [#allocation5], %s5119_s17, %s5119_s17, %s5120_s5  }
  0x6a   :  { %s5121_s29 = smov [#allocation8]   ;;  %s5122_s28 = smov [#allocation11]  }
  0x6b   :  { %s70_s13 = sshll.u32 %s5121_s29, 4  ;;  %s98_s0 = sshll.u32 %s5122_s28, 4  ;;  %s71_s13 = int_to_ptr.vmem [resolvable:$true] %s70_s13  ;;  %s99_s0 = int_to_ptr.vmem [resolvable:$true] %s98_s0 }
  0x6c   :  { %s4982_s30 = scalar_lea.hbm %s6044_s7, 2048 }
  0x6d   :  { %p4983_p12 = scmp.ne.s32.totalorder %s6044_s7, %s4982_s30  ;;  %p4986_p13 = scmp.lt.u32.totalorder %s4982_s30, %s6044_s7 }
  0x6f   :  { %p4988_p0 = pnand %p4986_p13, %p4983_p12 }
  0x71   :  { %4991 = shalt.err (!%p4988_p0)
}
  0x72   :  { %s4992_s3 = scalar_lea.vmem %s71_s13, 2048  ;;  %p4997_p2 = scmp.lt.s32.totalorder %s71_s13, %s71_s13 }
  0x73   :  { %p4993_p1 = scmp.ne.s32.totalorder %s71_s13, %s4992_s3  ;;  %p4998_p3 = scmp.lt.s32.totalorder %s4992_s3, %s4992_s3 }
  0x75   :  { %p4999_p4 = por %p4998_p3, %p4997_p2 }
  0x77   :  { %p5000_p5 = pnand %p4999_p4, %p4993_p1 }
  0x79   :  { %5003 = shalt.err (!%p5000_p5)
}
  0x7a   :  { %76 = dma.hbm_to_vmem [thread:$0]  %s6044_s7, 2048, %s71_s13, [#allocation7], %s5113_s22, %s5113_s22, %s5114_s23  }
  0x7b   :  { %s5004_s2 = scalar_lea.hbm %s6048_s11, 2048 }
  0x7c   :  { %p5005_p6 = scmp.ne.s32.totalorder %s6048_s11, %s5004_s2  ;;  %p5008_p7 = scmp.lt.u32.totalorder %s5004_s2, %s6048_s11 }
  0x7e   :  { %p5010_p8 = pnand %p5008_p7, %p5005_p6 }
  0x80   :  { %5013 = shalt.err (!%p5010_p8)
}
  0x81   :  { %s5014_s9 = scalar_lea.vmem %s99_s0, 2048  ;;  %p5019_p10 = scmp.lt.s32.totalorder %s99_s0, %s99_s0 }
  0x82   :  { %p5015_p9 = scmp.ne.s32.totalorder %s99_s0, %s5014_s9  ;;  %p5020_p11 = scmp.lt.s32.totalorder %s5014_s9, %s5014_s9 }
  0x84   :  { %p5021_p12 = por %p5020_p11, %p5019_p10 }
  0x86   :  { %p5022_p13 = pnand %p5021_p12, %p5015_p9 }
  0x88   :  { %5025 = shalt.err (!%p5022_p13)
}
  0x89   :  { %104 = dma.hbm_to_vmem [thread:$0]  %s6048_s11, 2048, %s99_s0, [#allocation10], %s5113_s22, %s5113_s22, %s5114_s23  }
  0x8a   :  { %s5123_s30 = smov [#allocation14]   ;;  %s5124_s1 = smov [#allocation17]  }
  0x8b   :  { %s126_s25 = sshll.u32 %s5123_s30, 4  ;;  %s154_s24 = sshll.u32 %s5124_s1, 4  ;;  %s127_s25 = int_to_ptr.vmem [resolvable:$true] %s126_s25  ;;  %s155_s24 = int_to_ptr.vmem [resolvable:$true] %s154_s24 }
  0x8c   :  { %s5026_s26 = scalar_lea.hbm %s6052_s15, 2048 }
  0x8d   :  { %p5027_p0 = scmp.ne.s32.totalorder %s6052_s15, %s5026_s26  ;;  %p5030_p1 = scmp.lt.u32.totalorder %s5026_s26, %s6052_s15 }
  0x8f   :  { %p5032_p2 = pnand %p5030_p1, %p5027_p0 }
  0x91   :  { %5035 = shalt.err (!%p5032_p2)
}
  0x92   :  { %s5036_s11 = scalar_lea.vmem %s127_s25, 2048  ;;  %p5041_p4 = scmp.lt.s32.totalorder %s127_s25, %s127_s25 }
  0x93   :  { %p5037_p3 = scmp.ne.s32.totalorder %s127_s25, %s5036_s11  ;;  %p5042_p5 = scmp.lt.s32.totalorder %s5036_s11, %s5036_s11 }
  0x95   :  { %p5043_p6 = por %p5042_p5, %p5041_p4 }
  0x97   :  { %p5044_p7 = pnand %p5043_p6, %p5037_p3 }
  0x99   :  { %5047 = shalt.err (!%p5044_p7)
}
  0x9a   :  { %132 = dma.hbm_to_vmem [thread:$0]  %s6052_s15, 2048, %s127_s25, [#allocation13], %s5113_s22, %s5113_s22, %s5114_s23  }
  0x9b   :  { %s5048_s4 = scalar_lea.hbm %s6056_s19, 2048 }
  0x9c   :  { %p5049_p8 = scmp.ne.s32.totalorder %s6056_s19, %s5048_s4  ;;  %p5052_p9 = scmp.lt.u32.totalorder %s5048_s4, %s6056_s19 }
  0x9e   :  { %p5054_p10 = pnand %p5052_p9, %p5049_p8 }
  0xa0   :  { %5057 = shalt.err (!%p5054_p10)
}
  0xa1   :  { %s5058_s1 = scalar_lea.vmem %s155_s24, 2048  ;;  %p5063_p12 = scmp.lt.s32.totalorder %s155_s24, %s155_s24 }
  0xa2   :  { %p5059_p11 = scmp.ne.s32.totalorder %s155_s24, %s5058_s1  ;;  %p5064_p13 = scmp.lt.s32.totalorder %s5058_s1, %s5058_s1 }
  0xa4   :  { %p5065_p0 = por %p5064_p13, %p5063_p12 }
  0xa6   :  { %p5066_p1 = pnand %p5065_p0, %p5059_p11 }
  0xa8   :  { %5069 = shalt.err (!%p5066_p1)
}
  0xa9   :  { %160 = dma.hbm_to_vmem [thread:$0]  %s6056_s19, 2048, %s155_s24, [#allocation16], %s5113_s22, %s5113_s22, %s5114_s23  }
  0xaa   :  { %5086 = dma.done.wait [#allocation5], 6144  }
  0xab   :  { %5087 = vsyncadd [#allocation5], 4294961152 }
  0xac   :  { %5088 = dma.done.wait [#allocation7], 4096  }
  0xad   :  { %5089 = vsyncadd [#allocation7], 4294963200 }
  0xae   :  { %5090 = dma.done.wait [#allocation10], 4096  }
  0xaf   :  { %5091 = vsyncadd [#allocation10], 4294963200 }
  0xb0   :  { %5092 = dma.done.wait [#allocation13], 4096  }
  0xb1   :  { %5093 = vsyncadd [#allocation13], 4294963200 }
  0xb2   :  { %5094 = dma.done.wait [#allocation16], 4096  }
  0xb3   :  { %5095 = vsyncadd [#allocation16], 4294963200  ;;  %v212_v0 = vlaneseq  ;;  %v5125_v1 = vmov 1983009808   ;;  %v5126_v3 = vmov 0.0   ;;  %vm263_vm0 = vcmask 1041408  }
  0xb4   :  { %v210_v2 = vunpack.c.l.s4 %v5125_v1  ;;  %334 = vmatprep.mubr.f32.mxu0 %v5126_v3  ;;  %s6073_s23 = sld [smem:[#allocation24_spill]]  ;;  %s6074_s3 = sld [smem:[#allocation23_spill]]  ;;  %vm258_vm1 = vcmask 15360  }
  0xb5   :  { %v213_v4 = vshrl.u32 %v212_v0, 7  ;;  %s6075_s15 = sld [smem:[#allocation27_spill]]  ;;  %s6076_s22 = sld [smem:[#allocation26_spill]] }
  0xb6   :  { %v211_v5 = vunpack.c.0.s8 %v210_v2 }
  0xb7   :  { %v510_v30 = vsub.s32 0, %v213_v4  ;;  %v514_v31 = vsub.s32 1, %v213_v4  ;;  %v518_v32 = vsub.s32 2, %v213_v4 }
  0xb8   :  { %v5378_v6 = vsub.s32 %v211_v5, %v213_v4 }
  0xba   :  { %v198_v7 = vld [vmem:[%s6073_s23] sm:$0x3f]  ;;  %v193_v13 = vld [vmem:[%s6074_s3 + $0x6] sm:$0x3]  ;;  %v194_v15 = vld [vmem:[%s6074_s3 + $0x8] sm:$0x3] }
  0xbb   :  { %v190_v8 = vld [vmem:[%s6074_s3] sm:$0x3]  ;;  %v191_v9 = vld [vmem:[%s6074_s3 + $0x2] sm:$0x3]  ;;  %v249_v10 = vrot.slane %v198_v7, %v5378_v6  ;;  %v242_v11 = vcombine.high %v198_v7, %v198_v7  ;;  %v192_v12 = vld [vmem:[%s6074_s3 + $0x4] sm:$0x3] }
  0xbc   :  { %v207_v14 = vcombine.low %v190_v8, %v191_v9  ;;  %v208_v16 = vcombine.low %v192_v12, %v193_v13  ;;  %v195_v17 = vld [vmem:[%s6074_s3 + $0xa] sm:$0x3]  ;;  %v196_v18 = vld [vmem:[%s6074_s3 + $0xc] sm:$0x3]  ;;  %v197_v19 = vld [vmem:[%s6074_s3 + $0xe] sm:$0x3] }
  0xbd   :  { %v257_v20 = vcombine.high %v249_v10, %v249_v10  ;;  %v256_v21 = vrot.slane %v242_v11, %v5378_v6  ;;  %v224_v23 = vcombine.low %v194_v15, %v195_v17  ;;  %v225_v25 = vcombine.low %v196_v18, %v197_v19  ;;  %v553_v33 = vld [vmem:[%s6075_s15] sm:$0x7]  ;;  %s5442_s23 = smov 0  }
  0xbe   :  { %v215_v22 = vrot.slane %v207_v14, %v5378_v6  ;;  %v222_v24 = vrot.slane %v208_v16, %v5378_v6  ;;  %v5421_v34 = vrot.slane %v553_v33, %v510_v30  ;;  %v5423_v35 = vrot.slane %v553_v33, %v514_v31  ;;  %v506_v37 = vld [vmem:[%s6076_s22] sm:$0x7] }
  0xbf   :  { %2856 = vmatprep.subr.msk.mxu0 %vm263_vm0, %v257_v20  ;;  %3305 = vmatprep.subr.msk.mxu1 %vm263_vm0, %v256_v21  ;;  %v232_v26 = vrot.slane %v224_v23, %v5378_v6  ;;  %v239_v28 = vrot.slane %v225_v25, %v5378_v6  ;;  %v5425_v36 = vrot.slane %v553_v33, %v518_v32  ;;  %v5440_v19 = vmov 0.0  }
  0xc0   :  { %2857 = vmatpush1.msk.msra.mxu0 %vm263_vm0, %v249_v10  ;;  %v223_v27 = vcombine.low %v215_v22, %v222_v24  ;;  %3306 = vmatpush3.msk.msra.mxu1 %vm263_vm0, %v256_v21  ;;  %v511_v38 = vrot.slane %v506_v37, %v510_v30  ;;  %v515_v39 = vrot.slane %v506_v37, %v514_v31 }
  0xc1   :  { %v240_v29 = vcombine.low %v232_v26, %v239_v28  ;;  %v519_v40 = vrot.slane %v506_v37, %v518_v32 }
  0xc2   :  { %2858 = vmatmul.mubr.msk.f32.vlgmr.msra.gmra.mrb[0].mxu0 %vm258_vm1, %v223_v27  ;;  %3307 = vmatprep.mubr.msk.f32.mxu1 %vm258_vm1, %v223_v27  ;;  %v520_v41 = vcombine.low %v511_v38, %v515_v39 }
  0xc3   :  { %340 = vmatprep.mubr.f32.mxu0 %v5126_v3  ;;  %3308 = vmatmul.mubr.msk.f32.vlgmr.msra.gmra.mrb[0].mxu1 %vm258_vm1, %v240_v29  ;;  %v534_v43 = vrot.slane %v519_v40, %v5378_v6 }
  0xc4   :  { %v527_v42 = vrot.slane %v520_v41, %v5378_v6 }
  0xc6   :  { %2859 = vmatmul.mubr.msk.f32.gmra.mrb[2].mxu0 %vm258_vm1, %v240_v29  ;;  %v535_v51 = vcombine.low %v527_v42, %v534_v43 }
 0x195   :  { %v336_v44 = vpop.f32.mrb[0].mxu0 }
 0x196   :  { %v338_v45 = vpop.f32.mrb[1].mxu0  ;;  %v3309_v48 = vpop.f32.mrb[0].mxu1 }
 0x197   :  { %v428_v46 = vcombine.low %v336_v44, %v338_v45  ;;  %v429_v47 = vcombine.high %v336_v44, %v338_v45  ;;  %v465_v49 = vcombine.high %v3309_v48, %v3309_v48  ;;  %v413_v50 = vpop.f32.mrb[1].mxu1  ;;  %v486_v5 = vrot.slane %v3309_v48, %v5378_v6 }
 0x198   :  { %v430_v54 = vcombine.high %v413_v50, %v413_v50  ;;  %v451_v55 = vrot.slane %v413_v50, %v5378_v6 }
 0x199   :  { %v437_v52 = vrot.slane %v428_v46, %v5378_v6  ;;  %v444_v53 = vrot.slane %v429_v47, %v5378_v6  ;;  %v342_v56 = vpop.f32.mrb[2].mxu0  ;;  %v493_v62 = vrot.slane %v465_v49, %v5378_v6 }
 0x19a   :  { %v344_v57 = vpop.f32.mrb[3].mxu0  ;;  %v458_v58 = vrot.slane %v430_v54, %v5378_v6 }
 0x19b   :  { %v459_v59 = vcombine.low %v437_v52, %v451_v55  ;;  %v460_v60 = vcombine.high %v437_v52, %v451_v55  ;;  %v463_v61 = vcombine.low %v342_v56, %v344_v57  ;;  %v464_v63 = vcombine.high %v342_v56, %v344_v57 }
 0x19c   :  { %v461_v0 = vcombine.low %v444_v53, %v458_v58  ;;  %v462_v1 = vcombine.high %v444_v53, %v458_v58 }
 0x19d   :  { %v537_v2 = vadd.f32 %v535_v51, %v459_v59  ;;  %v538_v4 = vadd.f32 %v535_v51, %v460_v60  ;;  %v472_v7 = vrot.slane %v463_v61, %v5378_v6  ;;  %v479_v8 = vrot.slane %v464_v63, %v5378_v6 }
 0x19e   :  { %v539_v9 = vadd.f32 %v535_v51, %v461_v0  ;;  %v540_v10 = vadd.f32 %v535_v51, %v462_v1 }
 0x19f   :  { %545 = vst [vmem:[#allocation2] sm:$0x3f] %v537_v2  ;;  %546 = vst [vmem:[#allocation2 + $0x6] sm:$0x3f] %v538_v4  ;;  %v494_v11 = vcombine.low %v472_v7, %v486_v5  ;;  %v495_v12 = vcombine.high %v472_v7, %v486_v5  ;;  %v496_v13 = vcombine.low %v479_v8, %v493_v62 }
 0x1a0   :  { %v497_v14 = vcombine.high %v479_v8, %v493_v62  ;;  %547 = vst [vmem:[#allocation2 + $0xc] sm:$0x3f] %v539_v9  ;;  %548 = vst [vmem:[#allocation2 + $0x12] sm:$0x3f] %v540_v10 }
 0x1a1   :  { %v541_v15 = vadd.f32 %v535_v51, %v494_v11  ;;  %v542_v16 = vadd.f32 %v535_v51, %v495_v12  ;;  %v543_v17 = vadd.f32 %v535_v51, %v496_v13 }
 0x1a2   :  { %v544_v18 = vadd.f32 %v535_v51, %v497_v14 }
 0x1a3   :  { %549 = vst [vmem:[#allocation2 + $0x18] sm:$0x3f] %v541_v15  ;;  %550 = vst [vmem:[#allocation2 + $0x1e] sm:$0x3f] %v542_v16 }
 0x1a4   :  { %551 = vst [vmem:[#allocation2 + $0x24] sm:$0x3f] %v543_v17  ;;  %552 = vst [vmem:[#allocation2 + $0x2a] sm:$0x3f] %v544_v18 }
 0x1a5 LB: > { %v582_v20 = vld [vmem:[#allocation4 + $0x8] sm:$0xff]  ;;  %v585_v21 = vld [vmem:[#allocation4 + $0x20] sm:$0xff]  ;;  %v584_v24 = vld [vmem:[#allocation4 + $0x18] sm:$0xff]  ;;  %v5127_v27 = vmov 0.0|0.0   ;;  %v5128_v28 = vmov 0.0   ;;  %vm5129_vm2 = vmmov 0   ;;  %s5102_s23 = sphi %s5442_s23, %s575_s23   ;;  %v5098_v19 = vphi %v5440_v19, %v6077_v19  }
 0x1a6   : > { %v581_v22 = vld [vmem:[#allocation4] sm:$0xff]  ;;  %v4150_v23 = vpack.c.bf16 %v585_v21, %v582_v20  ;;  %v588_v25 = vld [vmem:[#allocation4 + $0x38] sm:$0xff]  ;;  %v591_v26 = vld [vmem:[#allocation4 + $0x50] sm:$0xff]  ;;  %4182 = vmatprep.subr.bf16.mxu1 %v5127_v27  ;;  %693 = vmatprep.mubr.f32.mxu0 %v5128_v28  ;;  %s2891_s24 = smul.u32 6, %s5102_s23  ;;  %s575_s23 = sadd.s32 1, %s5102_s23  }
 0x1a7   : > { %v4152_v29 = vpack.c.bf16 %v584_v24, %v581_v22  ;;  %v4154_v30 = vpack.c.bf16 %v591_v26, %v588_v25  ;;  %v587_v31 = vld [vmem:[#allocation4 + $0x30] sm:$0xff]  ;;  %v590_v32 = vld [vmem:[#allocation4 + $0x48] sm:$0xff]  ;;  %3342 = vmatprep.mubr.msk.f32.mxu1 %vm5129_vm2, %v5128_v28  ;;  %v597_v37 = vld [vmem:[#allocation4 + $0x80] sm:$0xff]  ;;  %p572_p2 = scmp.ge.s32.totalorder %s575_s23, 8  }
 0x1a8   : > { %v594_v33 = vld [vmem:[#allocation4 + $0x68] sm:$0xff]  ;;  %4151 = vmatprep.subr.bf16.mxu0 %v4150_v23  ;;  %v4156_v38 = vpack.c.bf16 %v590_v32, %v587_v31  ;;  %v593_v40 = vld [vmem:[#allocation4 + $0x60] sm:$0xff]  ;;  %v596_v41 = vld [vmem:[#allocation4 + $0x78] sm:$0xff]  ;;  %s579_s20 = scalar_lea.vmem [#allocation2], %s2891_s24  ;;  %vm5131_vm3 = vmmov (%p572_p2), 0  }
 0x1a9   : > { %4153 = vmatpush1.bf16.msra.mxu0 %v4152_v29  ;;  %v4158_v39 = vpack.c.bf16 %v597_v37, %v594_v33  ;;  %v600_v42 = vld [vmem:[#allocation4 + $0x98] sm:$0xff]  ;;  %v603_v43 = vld [vmem:[#allocation4 + $0xb0] sm:$0xff]  ;;  %v4160_v44 = vpack.c.bf16 %v596_v41, %v593_v40  ;;  %v602_v47 = vld [vmem:[#allocation4 + $0xa8] sm:$0xff] }
 0x1aa   : > { %4155 = vmatprep.subr.bf16.mxu0 %v4154_v30  ;;  %v4162_v45 = vpack.c.bf16 %v603_v43, %v600_v42  ;;  %v599_v46 = vld [vmem:[#allocation4 + $0x90] sm:$0xff]  ;;  %v606_v48 = vld [vmem:[#allocation4 + $0xc8] sm:$0xff]  ;;  %v609_v49 = vld [vmem:[#allocation4 + $0xe0] sm:$0xff] }
 0x1ab   : > { %v583_v50 = vld [vmem:[#allocation4 + $0x10] sm:$0xff]  ;;  %v586_v51 = vld [vmem:[#allocation4 + $0x28] sm:$0xff]  ;;  %v589_v53 = vld [vmem:[#allocation4 + $0x40] sm:$0xff]  ;;  %v4164_v55 = vpack.c.bf16 %v602_v47, %v599_v46  ;;  %v4166_v56 = vpack.c.bf16 %v609_v49, %v606_v48 }
 0x1ac   : > { %v4183_v52 = vpack.c.bf16 %v586_v51, %v583_v50  ;;  %v592_v54 = vld [vmem:[#allocation4 + $0x58] sm:$0xff]  ;;  %v605_v57 = vld [vmem:[#allocation4 + $0xc0] sm:$0xff]  ;;  %v615_v61 = vld [vmem:[#allocation4 + $0x110] sm:$0xff] }
 0x1ad   : > { %4157 = vmatpush1.bf16.msra.mxu0 %v4156_v38  ;;  %v608_v58 = vld [vmem:[#allocation4 + $0xd8] sm:$0xff]  ;;  %v4186_v60 = vpack.c.bf16 %v592_v54, %v589_v53  ;;  %v595_v62 = vld [vmem:[#allocation4 + $0x70] sm:$0xff]  ;;  %v598_v63 = vld [vmem:[#allocation4 + $0x88] sm:$0xff] }
 0x1ae   : > { %4159 = vmatprep.subr.bf16.mxu0 %v4158_v39  ;;  %v612_v59 = vld [vmem:[#allocation4 + $0xf8] sm:$0xff]  ;;  %4184 = vmatpush3.bf16.msra.mxu1 %v4183_v52  ;;  %v4168_v0 = vpack.c.bf16 %v608_v58, %v605_v57  ;;  %v611_v2 = vld [vmem:[#allocation4 + $0xf0] sm:$0xff]  ;;  %v614_v4 = vld [vmem:[#allocation4 + $0x108] sm:$0xff]  ;;  %v4189_v7 = vpack.c.bf16 %v598_v63, %v595_v62 }
 0x1af   : > { %4185 = vmatprep.subr.bf16.mxu1 %v5127_v27  ;;  %v4170_v1 = vpack.c.bf16 %v615_v61, %v612_v59  ;;  %v618_v5 = vld [vmem:[#allocation4 + $0x128] sm:$0xff]  ;;  %v621_v8 = vld [vmem:[#allocation4 + $0x140] sm:$0xff]  ;;  %v604_v10 = vld [vmem:[#allocation4 + $0xb8] sm:$0xff]  ;;  %v4172_v11 = vpack.c.bf16 %v614_v4, %v611_v2 }
 0x1b0   : > { %v601_v9 = vld [vmem:[#allocation4 + $0xa0] sm:$0xff]  ;;  %v4174_v12 = vpack.c.bf16 %v621_v8, %v618_v5  ;;  %v620_v14 = vld [vmem:[#allocation4 + $0x138] sm:$0xff]  ;;  %v627_v17 = vld [vmem:[#allocation4 + $0x170] sm:$0xff] }
 0x1b1   : > { %4161 = vmatpush1.bf16.msra.mxu0 %v4160_v44  ;;  %v617_v13 = vld [vmem:[#allocation4 + $0x120] sm:$0xff]  ;;  %v624_v15 = vld [vmem:[#allocation4 + $0x158] sm:$0xff]  ;;  %v4192_v16 = vpack.c.bf16 %v604_v10, %v601_v9  ;;  %v607_v18 = vld [vmem:[#allocation4 + $0xd0] sm:$0xff] }
 0x1b2   : > { %4163 = vmatprep.subr.bf16.mxu0 %v4162_v45  ;;  %4187 = vmatpush3.bf16.msra.mxu1 %v4186_v60  ;;  %v610_v20 = vld [vmem:[#allocation4 + $0xe8] sm:$0xff]  ;;  %v4176_v21 = vpack.c.bf16 %v620_v14, %v617_v13  ;;  %v4178_v22 = vpack.c.bf16 %v627_v17, %v624_v15  ;;  %v623_v23 = vld [vmem:[#allocation4 + $0x150] sm:$0xff]  ;;  %v613_v26 = vld [vmem:[#allocation4 + $0x100] sm:$0xff] }
 0x1b3   : > { %4188 = vmatprep.subr.bf16.mxu1 %v5127_v27  ;;  %v626_v24 = vld [vmem:[#allocation4 + $0x168] sm:$0xff]  ;;  %v4195_v25 = vpack.c.bf16 %v610_v20, %v607_v18  ;;  %v616_v28 = vld [vmem:[#allocation4 + $0x118] sm:$0xff]  ;;  %v619_v31 = vld [vmem:[#allocation4 + $0x130] sm:$0xff] }
 0x1b4   : > { %v4180_v29 = vpack.c.bf16 %v626_v24, %v623_v23  ;;  %v4198_v30 = vpack.c.bf16 %v616_v28, %v613_v26  ;;  %v622_v32 = vld [vmem:[#allocation4 + $0x148] sm:$0xff]  ;;  %v625_v37 = vld [vmem:[#allocation4 + $0x160] sm:$0xff]  ;;  %v628_v38 = vld [vmem:[#allocation4 + $0x178] sm:$0xff] }
 0x1b5   : > { %4165 = vmatpush1.bf16.msra.mxu0 %v4164_v55  ;;  %v4201_v33 = vpack.c.bf16 %v622_v32, %v619_v31  ;;  %v4204_v39 = vpack.c.bf16 %v628_v38, %v625_v37  ;;  %v580_v40 = vld [vmem:[%s579_s20] sm:$0x3f]  ;;  %v797_v4 = vld [vmem:[#allocation6 + $0x8] sm:$0xff] (%p572_p2)  ;;  %v798_v5 = vld [vmem:[#allocation6 + $0x10] sm:$0xff] (%p572_p2) }
 0x1b6   : > { %4167 = vmatprep.subr.bf16.mxu0 %v4166_v56  ;;  %4190 = vmatpush3.bf16.msra.mxu1 %v4189_v7  ;;  %v778_v45 = vrot.slane %v580_v40, 2  ;;  %v788_v56 = vrot.slane %v580_v40, 4  ;;  %v796_v2 = vld [vmem:[#allocation6] sm:$0xff] (%p572_p2)  ;;  %v5130_v7 = vmov (%p572_p2), 0.0|0.0   ;;  %v799_v9 = vld [vmem:[#allocation6 + $0x18] sm:$0xff] (%p572_p2)  ;;  %v802_v13 = vld [vmem:[#allocation6 + $0x30] sm:$0xff] (%p572_p2) }
 0x1b7   : > { %4191 = vmatprep.subr.bf16.mxu1 %v5127_v27  ;;  %v4207_v8 = vpack.c.bf16 (%p572_p2), %v797_v4, %v796_v2  ;;  %v800_v10 = vld [vmem:[#allocation6 + $0x20] sm:$0xff] (%p572_p2)  ;;  %v803_v14 = vld [vmem:[#allocation6 + $0x38] sm:$0xff] (%p572_p2)  ;;  %v809_v20 = vld [vmem:[#allocation6 + $0x68] sm:$0xff] (%p572_p2) }
 0x1b8   :  { %v808_v18 = vld [vmem:[#allocation6 + $0x60] sm:$0xff] (%p572_p2)  ;;  %v811_v23 = vld [vmem:[#allocation6 + $0x78] sm:$0xff] (%p572_p2) }
 0x1b9   : > { %4169 = vmatpush1.bf16.msra.mxu0 %v4168_v0  ;;  %v5479_v26 = vld [vmem:[%s6047_s10] ss:$0 sm:$0xff] (%p572_p2)  ;;  %s5501_s10 = smov (%p572_p2), 1  }
 0x1ba   : > { %4171 = vmatprep.subr.bf16.mxu0 %v4170_v1  ;;  %4193 = vmatpush3.bf16.msra.mxu1 %v4192_v16  ;;  %v806_v16 = vld [vmem:[#allocation6 + $0x50] sm:$0xff] (%p572_p2)  ;;  %v5484_v28 = vld [vmem:[%s6049_s12] ss:$0 sm:$0xff] (%p572_p2) }
 0x1bb   : > { %4194 = vmatprep.subr.bf16.mxu1 %v5127_v27  ;;  %v2866_v31 = vld [vmem:[%s6043_s6] ss:$0 sm:$0xff] (%p572_p2) }
 0x1bd   : > { %4173 = vmatpush1.bf16.msra.mxu0 %v4172_v11  ;;  %v801_v11 = vld [vmem:[#allocation6 + $0x28] sm:$0xff] (%p572_p2) }
 0x1be   : > { %4175 = vmatprep.subr.bf16.mxu0 %v4174_v12  ;;  %4196 = vmatpush3.bf16.msra.mxu1 %v4195_v25  ;;  %v4213_v12 = vpack.c.bf16 (%p572_p2), %v801_v11, %v800_v10  ;;  %v5474_v25 = vld [vmem:[%s6045_s8] ss:$0 sm:$0xff] (%p572_p2) }
 0x1bf   : > { %4197 = vmatprep.subr.bf16.mxu1 %v5127_v27 }
 0x1c1   : > { %4177 = vmatpush1.bf16.msra.mxu0 %v4176_v21  ;;  %v4225_v21 = vpack.c.bf16 (%p572_p2), %v809_v20, %v808_v18 }
 0x1c2   : > { %4179 = vmatprep.subr.bf16.mxu0 %v4178_v22  ;;  %4199 = vmatpush3.bf16.msra.mxu1 %v4198_v30  ;;  %v810_v22 = vld [vmem:[#allocation6 + $0x70] sm:$0xff] (%p572_p2)  ;;  %v5494_v30 = vld [vmem:[%s6053_s16] ss:$0 sm:$0xff] (%p572_p2) }
 0x1c3   : > { %4200 = vmatprep.subr.bf16.mxu1 %v5127_v27  ;;  %v4228_v24 = vpack.c.bf16 (%p572_p2), %v811_v23, %v810_v22 }
 0x1c5   : > { %4181 = vmatpush1.bf16.msra.mxu0 %v4180_v29  ;;  %v5489_v29 = vld [vmem:[%s6051_s14] ss:$0 sm:$0xff] (%p572_p2) }
 0x1c6   : > { %4202 = vmatpush3.bf16.msra.mxu1 %v4201_v33  ;;  %4206 = vmatprep.subr.bf16.mxu0 (%p572_p2), %v5130_v7 }
 0x1c7   : > { %4203 = vmatprep.subr.bf16.mxu1 %v5127_v27 }
 0x1c8   : > { %694 = vmatmul.mubr.f32.vlgmr.msra.gmra.mrb[0].mxu0 %v5098_v19 }
 0x1c9   :  { %3377 = vmatprep.mubr.msk.f32.mxu0 (%p572_p2), %vm5131_vm3, %v5126_v3  ;;  %4208 = vmatpush3.bf16.msra.mxu0 (%p572_p2), %v4207_v8  ;;  %v807_v3 = vld [vmem:[#allocation6 + $0x58] sm:$0xff] (%p572_p2) }
 0x1ca   : > { %4205 = vmatpush3.bf16.msra.mxu1 %v4204_v39  ;;  %4209 = vmatprep.subr.bf16.mxu0 (%p572_p2), %v5130_v7  ;;  %v4222_v17 = vpack.c.bf16 (%p572_p2), %v807_v3, %v806_v16 }
 0x1cd   : > { %3343 = vmatmul.mubr.f32.vlgmr.msra.gmra.mrb[0].mxu1 %v5098_v19 }
 0x29b   : > { %v695_v41 = vpop.f32.mrb[0].mxu0 }
 0x29c   : > { %v696_v42 = vadd.f32 %v695_v41, %v5421_v34  ;;  %v697_v43 = vpop.f32.mrb[1].mxu0  ;;  %v4216_v34 = vpack.c.bf16 (%p572_p2), %v803_v14, %v802_v13 }
 0x29d   : > { %v698_v44 = vadd.f32 %v697_v43, %v5423_v35  ;;  %v804_v35 = vld [vmem:[#allocation6 + $0x40] sm:$0xff] (%p572_p2) }
 0x29e   : > { %v770_v46 = vadd.f32 %v696_v42, %v580_v40 }
 0x29f   : > { %v780_v48 = vadd.f32 %v778_v45, %v698_v44 }
 0x2a0   : > { %v2864_v47 = vmul.f32 -1.442695, %v770_v46  ;;  %v766_v49 = vpop.f32.mrb[0].mxu1 }
 0x2a1   : > { %v2865_v50 = vmul.f32 -1.442695, %v780_v48  ;;  %v3344_v27 = vpop.f32.mrb[1].mxu1  ;;  %v767_v55 = vadd.f32 %v766_v49, %v5425_v36  ;;  %v805_v36 = vld [vmem:[#allocation6 + $0x48] sm:$0xff] (%p572_p2) }
 0x2a2   : > { %4830 = vpow2.f32 %v2864_v47  ;;  %v4219_v15 = vpack.c.bf16 (%p572_p2), %v805_v36, %v804_v35 }
 0x2a3   : > { %4832 = vpow2.f32 %v2865_v50 }
 0x2ac   : > { %v4831_v51 = vpop.eup %4830 }
 0x2ad   : > { %v774_v52 = vadd.f32 1.0, %v4831_v51  ;;  %v4833_v53 = vpop.eup %4832 }
 0x2ae   : > { %v784_v54 = vadd.f32 1.0, %v4833_v53 }
 0x2af   : > { %4834 = vrcp.f32 %v774_v52 }
 0x2b0   : > { %4836 = vrcp.f32 %v784_v54 }
 0x2b9   : > { %v4835_v57 = vpop.eup %4834 }
 0x2ba   : > { %v787_v58 = vmul.f32 %v4835_v57, %v767_v55  ;;  %v4837_v60 = vpop.eup %4836 }
 0x2bb   : > { %v792_v61 = vsub.f32 1.0, %v4837_v60  ;;  %v794_v63 = vmul.f32 %v5098_v19, %v4837_v60 }
 0x2bc   : > { %v790_v59 = vadd.f32 %v788_v56, %v787_v58 }
 0x2be   : > { %4838 = vtanh.f32 %v790_v59 }
 0x2c7   :  { %574 = sbr.rel (!%p572_p2) target bundleno = 421 (0x1a5), region = 156 }
 0x2c8   : > { %v4839_v62 = vpop.eup %4838 }
 0x2c9   : > { %v793_v0 = vmul.f32 %v4839_v62, %v792_v61 }
 0x2cb   : > { %v795_v1 = vadd.f32 %v794_v63, %v793_v0  }
 0x2cd   : > { %v6077_v19 = vmov %v795_v1 }
 0x2ce   :  { %v4210_v19 = vpack.c.bf16 %v799_v9, %v798_v5 }
 0x2d0   :  { %4211 = vmatpush3.bf16.msra.mxu0 %v4210_v19 }
 0x2d1   :  { %4212 = vmatprep.subr.bf16.mxu0 %v5130_v7 }
 0x2d4   :  { %4214 = vmatpush3.bf16.msra.mxu0 %v4213_v12 }
 0x2d5   :  { %4215 = vmatprep.subr.bf16.mxu0 %v5130_v7 }
 0x2d8   :  { %4217 = vmatpush3.bf16.msra.mxu0 %v4216_v34 }
 0x2d9   :  { %4218 = vmatprep.subr.bf16.mxu0 %v5130_v7 }
 0x2dc   :  { %4220 = vmatpush3.bf16.msra.mxu0 %v4219_v15 }
 0x2dd   :  { %4221 = vmatprep.subr.bf16.mxu0 %v5130_v7 }
 0x2e0   :  { %4223 = vmatpush3.bf16.msra.mxu0 %v4222_v17 }
 0x2e1   :  { %4224 = vmatprep.subr.bf16.mxu0 %v5130_v7 }
 0x2e4   :  { %4226 = vmatpush3.bf16.msra.mxu0 %v4225_v21 }
 0x2e5   :  { %4227 = vmatprep.subr.bf16.mxu0 %v5130_v7 }
 0x2e8   :  { %4229 = vmatpush3.bf16.msra.mxu0 %v4228_v24 }
 0x2eb   :  { %3378 = vmatmul.mubr.f32.vlgmr.msra.gmra.mrb[0].mxu0 %v795_v1 }
 0x3be   :  { %v885_v32 = vpop.f32.mrb[0].mxu0 }
 0x3bf   :  { %v886_v33 = vadd.f32 %v2866_v31, %v885_v32   ;;  %v3379_v37 = vpop.f32.mrb[1].mxu0 }
 0x3c1   :  { %924 = vst [vmem:[#allocation3] sm:$0x3] %v886_v33 }
 0x3c2 LB: > { %v932_v38 = vld [vmem:[#allocation8] sm:$0xff]  ;;  %v933_v39 = vld [vmem:[#allocation8 + $0x8] sm:$0xff]  ;;  %v934_v40 = vld [vmem:[#allocation8 + $0x10] sm:$0xff]  ;;  %v5132_v41 = vmov 0.0|0.0   ;;  %vm5133_vm4 = vmmov 0   ;;  %v5134_v44 = vmov 0.0   ;;  %s5110_s10 = sphi %s5501_s10, %s930_s10   ;;  %v5106_v33 = vphi %v886_v33, %v2520_v33  }
 0x3c3   : > { %4230 = vmatprep.subr.bf16.mxu0 %v5132_v41  ;;  %v5510_v42 = vpack.c.bf16 %v933_v39, %v932_v38  ;;  %v935_v43 = vld [vmem:[#allocation8 + $0x18] sm:$0xff]  ;;  %3412 = vmatprep.mubr.msk.f32.mxu0 %vm5133_vm4, %v5134_v44  ;;  %v936_v46 = vld [vmem:[#allocation8 + $0x20] sm:$0xff]  ;;  %v937_v47 = vld [vmem:[#allocation8 + $0x28] sm:$0xff]  ;;  %s2888_s6 = sshll.u32 %s5110_s10, 1  ;;  %s930_s10 = sadd.s32 1, %s5110_s10  }
 0x3c4   : > { %4254 = vmatprep.subr.bf16.mxu1 %v5132_v41  ;;  %3447 = vmatprep.mubr.msk.f32.mxu1 %vm5133_vm4, %v5134_v44  ;;  %v5518_v45 = vpack.c.bf16 %v935_v43, %v934_v40  ;;  %v1024_v48 = vld [vmem:[#allocation9] sm:$0xff]  ;;  %v1025_v49 = vld [vmem:[#allocation9 + $0x8] sm:$0xff]  ;;  %v1026_v27 = vld [vmem:[#allocation9 + $0x10] sm:$0xff]  ;;  %v5524_v52 = vpack.c.bf16 %v937_v47, %v936_v46  ;;  %s2522_s12 = scalar_lea.vmem [#allocation3], %s2888_s6  ;;  %p927_p3 = scmp.ge.s32.totalorder %s930_s10, 8  }
 0x3c5   : > { %4232 = vmatpush3.bf16.msra.mxu0 %v5510_v42  ;;  %v5521_v50 = vpack.c.bf16 %v1025_v49, %v1024_v48  ;;  %v1027_v51 = vld [vmem:[#allocation9 + $0x18] sm:$0xff]  ;;  %v938_v53 = vld [vmem:[#allocation8 + $0x30] sm:$0xff]  ;;  %v1028_v56 = vld [vmem:[#allocation9 + $0x20] sm:$0xff]  ;;  %s6078_s7 = sld [smem:[#allocation29_spill]] (%p927_p3)  ;;  %s6079_s30 = sld [smem:[#allocation30_spill]] (%p927_p3) }
 0x3c6   : > { %4233 = vmatprep.subr.bf16.mxu0 %v5132_v41  ;;  %v939_v54 = vld [vmem:[#allocation8 + $0x38] sm:$0xff]  ;;  %v5528_v55 = vpack.c.bf16 %v1027_v51, %v1026_v27  ;;  %v1029_v57 = vld [vmem:[#allocation9 + $0x28] sm:$0xff]  ;;  %v940_v59 = vld [vmem:[#allocation8 + $0x40] sm:$0xff] }
 0x3c7   : > { %4256 = vmatpush3.bf16.msra.mxu1 %v5521_v50  ;;  %v5532_v58 = vpack.c.bf16 %v939_v54, %v938_v53  ;;  %v941_v60 = vld [vmem:[#allocation8 + $0x48] sm:$0xff]  ;;  %v5536_v61 = vpack.c.bf16 %v1029_v57, %v1028_v56  ;;  %v942_v63 = vld [vmem:[#allocation8 + $0x50] sm:$0xff]  ;;  %v943_v0 = vld [vmem:[#allocation8 + $0x58] sm:$0xff] }
 0x3c8   : > { %4257 = vmatprep.subr.bf16.mxu1 %v5132_v41  ;;  %v5540_v62 = vpack.c.bf16 %v941_v60, %v940_v59  ;;  %v5546_v1 = vpack.c.bf16 %v943_v0, %v942_v63  ;;  %v944_v2 = vld [vmem:[#allocation8 + $0x60] sm:$0xff]  ;;  %v945_v4 = vld [vmem:[#allocation8 + $0x68] sm:$0xff]  ;;  %v946_v7 = vld [vmem:[#allocation8 + $0x70] sm:$0xff] }
 0x3c9   : > { %4235 = vmatpush3.bf16.msra.mxu0 %v5518_v45  ;;  %v5550_v5 = vpack.c.bf16 %v945_v4, %v944_v2  ;;  %v947_v8 = vld [vmem:[#allocation8 + $0x78] sm:$0xff]  ;;  %v1030_v19 = vld [vmem:[#allocation9 + $0x30] sm:$0xff]  ;;  %v1032_v12 = vld [vmem:[#allocation9 + $0x40] sm:$0xff] }
 0x3ca   : > { %4236 = vmatprep.subr.bf16.mxu0 %v5132_v41  ;;  %v5554_v9 = vpack.c.bf16 %v947_v8, %v946_v7  ;;  %v1031_v10 = vld [vmem:[#allocation9 + $0x38] sm:$0xff]  ;;  %v1033_v13 = vld [vmem:[#allocation9 + $0x48] sm:$0xff]  ;;  %v1034_v34 = vld [vmem:[#allocation9 + $0x50] sm:$0xff] }
 0x3cb   : > { %4259 = vmatpush3.bf16.msra.mxu1 %v5528_v55  ;;  %v5562_v11 = vpack.c.bf16 %v1031_v10, %v1030_v19  ;;  %v5566_v14 = vpack.c.bf16 %v1033_v13, %v1032_v12  ;;  %v1035_v35 = vld [vmem:[#allocation9 + $0x58] sm:$0xff]  ;;  %v1036_v36 = vld [vmem:[#allocation9 + $0x60] sm:$0xff]  ;;  %v1037_v16 = vld [vmem:[#allocation9 + $0x68] sm:$0xff] }
 0x3cc   : > { %4260 = vmatprep.subr.bf16.mxu1 %v5132_v41  ;;  %v5570_v15 = vpack.c.bf16 %v1035_v35, %v1034_v34  ;;  %v5573_v3 = vpack.c.bf16 %v1037_v16, %v1036_v36  ;;  %v1038_v17 = vld [vmem:[#allocation9 + $0x70] sm:$0xff]  ;;  %v1039_v18 = vld [vmem:[#allocation9 + $0x78] sm:$0xff]  ;;  %v1116_v21 = vld [vmem:[#allocation11] sm:$0xff] }
 0x3cd   : > { %4238 = vmatpush3.bf16.msra.mxu0 %v5524_v52  ;;  %v5577_v20 = vpack.c.bf16 %v1039_v18, %v1038_v17  ;;  %v1117_v22 = vld [vmem:[#allocation11 + $0x8] sm:$0xff]  ;;  %v1118_v23 = vld [vmem:[#allocation11 + $0x10] sm:$0xff]  ;;  %v1119_v31 = vld [vmem:[#allocation11 + $0x18] sm:$0xff] }
 0x3ce   : > { %4239 = vmatprep.subr.bf16.mxu0 %v5132_v41  ;;  %v5582_v24 = vpack.c.bf16 %v1117_v22, %v1116_v21  ;;  %v5585_v32 = vpack.c.bf16 %v1119_v31, %v1118_v23  ;;  %v1120_v37 = vld [vmem:[#allocation11 + $0x20] sm:$0xff]  ;;  %v1121_v38 = vld [vmem:[#allocation11 + $0x28] sm:$0xff]  ;;  %v1122_v53 = vld [vmem:[#allocation11 + $0x30] sm:$0xff] }
 0x3cf   : > { %4262 = vmatpush3.bf16.msra.mxu1 %v5536_v61  ;;  %v5589_v39 = vpack.c.bf16 %v1121_v38, %v1120_v37  ;;  %v1123_v54 = vld [vmem:[#allocation11 + $0x38] sm:$0xff]  ;;  %v1124_v57 = vld [vmem:[#allocation11 + $0x40] sm:$0xff]  ;;  %v1125_v59 = vld [vmem:[#allocation11 + $0x48] sm:$0xff] }
 0x3d0   : > { %4263 = vmatprep.subr.bf16.mxu1 %v5132_v41  ;;  %v5597_v56 = vpack.c.bf16 %v1123_v54, %v1122_v53  ;;  %v5601_v60 = vpack.c.bf16 %v1125_v59, %v1124_v57  ;;  %v1126_v63 = vld [vmem:[#allocation11 + $0x50] sm:$0xff]  ;;  %v1127_v0 = vld [vmem:[#allocation11 + $0x58] sm:$0xff]  ;;  %v1128_v2 = vld [vmem:[#allocation11 + $0x60] sm:$0xff] }
 0x3d1   : > { %4241 = vmatpush3.bf16.msra.mxu0 %v5532_v58  ;;  %v5605_v4 = vpack.c.bf16 %v1127_v0, %v1126_v63  ;;  %v1129_v7 = vld [vmem:[#allocation11 + $0x68] sm:$0xff]  ;;  %v1130_v19 = vld [vmem:[#allocation11 + $0x70] sm:$0xff]  ;;  %v1131_v10 = vld [vmem:[#allocation11 + $0x78] sm:$0xff] }
 0x3d2   : > { %4242 = vmatprep.subr.bf16.mxu0 %v5132_v41  ;;  %v5608_v8 = vpack.c.bf16 %v1129_v7, %v1128_v2  ;;  %v5612_v12 = vpack.c.bf16 %v1131_v10, %v1130_v19  ;;  %v1208_v13 = vld [vmem:[#allocation12] sm:$0xff]  ;;  %v1209_v34 = vld [vmem:[#allocation12 + $0x8] sm:$0xff]  ;;  %v1210_v35 = vld [vmem:[#allocation12 + $0x10] sm:$0xff] }
 0x3d3   : > { %4265 = vmatpush3.bf16.msra.mxu1 %v5562_v11  ;;  %v5617_v36 = vpack.c.bf16 %v1209_v34, %v1208_v13  ;;  %v1211_v16 = vld [vmem:[#allocation12 + $0x18] sm:$0xff]  ;;  %v1212_v18 = vld [vmem:[#allocation12 + $0x20] sm:$0xff]  ;;  %v1213_v21 = vld [vmem:[#allocation12 + $0x28] sm:$0xff] }
 0x3d4   : > { %4266 = vmatprep.subr.bf16.mxu1 %v5132_v41  ;;  %v5620_v17 = vpack.c.bf16 %v1211_v16, %v1210_v35  ;;  %v5624_v22 = vpack.c.bf16 %v1213_v21, %v1212_v18  ;;  %v1217_v53 = vld [vmem:[#allocation12 + $0x48] sm:$0xff]  ;;  %v1218_v57 = vld [vmem:[#allocation12 + $0x50] sm:$0xff]  ;;  %v1219_v59 = vld [vmem:[#allocation12 + $0x58] sm:$0xff] }
 0x3d5   : > { %4244 = vmatpush3.bf16.msra.mxu0 %v5540_v62  ;;  %v1220_v63 = vld [vmem:[#allocation12 + $0x60] sm:$0xff]  ;;  %v5640_v0 = vpack.c.bf16 %v1219_v59, %v1218_v57  ;;  %v1221_v2 = vld [vmem:[#allocation12 + $0x68] sm:$0xff]  ;;  %v1222_v19 = vld [vmem:[#allocation12 + $0x70] sm:$0xff] }
 0x3d6   : > { %4245 = vmatprep.subr.bf16.mxu0 %v5132_v41  ;;  %v5643_v7 = vpack.c.bf16 %v1221_v2, %v1220_v63  ;;  %v1223_v10 = vld [vmem:[#allocation12 + $0x78] sm:$0xff]  ;;  %v1300_v34 = vld [vmem:[#allocation14] sm:$0xff]  ;;  %v1301_v35 = vld [vmem:[#allocation14 + $0x8] sm:$0xff] }
 0x3d7   : > { %4268 = vmatpush3.bf16.msra.mxu1 %v5566_v14  ;;  %v5647_v13 = vpack.c.bf16 %v1223_v10, %v1222_v19  ;;  %v1302_v16 = vld [vmem:[#allocation14 + $0x10] sm:$0xff]  ;;  %v5652_v18 = vpack.c.bf16 %v1301_v35, %v1300_v34  ;;  %v1303_v21 = vld [vmem:[#allocation14 + $0x18] sm:$0xff]  ;;  %v1308_v2 = vld [vmem:[#allocation14 + $0x40] sm:$0xff] }
 0x3d8   : > { %4269 = vmatprep.subr.bf16.mxu1 %v5132_v41  ;;  %v1306_v57 = vld [vmem:[#allocation14 + $0x30] sm:$0xff]  ;;  %v1307_v59 = vld [vmem:[#allocation14 + $0x38] sm:$0xff]  ;;  %v1309_v19 = vld [vmem:[#allocation14 + $0x48] sm:$0xff] }
 0x3d9   : > { %4247 = vmatpush3.bf16.msra.mxu0 %v5546_v1  ;;  %v5683_v63 = vpack.c.bf16 %v1307_v59, %v1306_v57  ;;  %v5687_v10 = vpack.c.bf16 %v1309_v19, %v1308_v2  ;;  %v1310_v34 = vld [vmem:[#allocation14 + $0x50] sm:$0xff]  ;;  %v1311_v35 = vld [vmem:[#allocation14 + $0x58] sm:$0xff] }
 0x3da   : > { %4248 = vmatprep.subr.bf16.mxu0 %v5132_v41 }
 0x3db   : > { %4271 = vmatpush3.bf16.msra.mxu1 %v5570_v15 }
 0x3dc   : > { %4272 = vmatprep.subr.bf16.mxu1 %v5132_v41 }
 0x3dd   : > { %4250 = vmatpush3.bf16.msra.mxu0 %v5550_v5 }
 0x3de   : > { %4251 = vmatprep.subr.bf16.mxu0 %v5132_v41 }
 0x3df   : > { %4274 = vmatpush3.bf16.msra.mxu1 %v5573_v3 }
 0x3e0   : > { %4275 = vmatprep.subr.bf16.mxu1 %v5132_v41 }
 0x3e1   : > { %4253 = vmatpush3.bf16.msra.mxu0 %v5554_v9 }
 0x3e2   : > { %4278 = vmatprep.subr.bf16.mxu0 %v5132_v41 }
 0x3e3   : > { %4277 = vmatpush3.bf16.msra.mxu1 %v5577_v20 }
 0x3e4   : > { %3413 = vmatmul.mubr.f32.vlgmr.msra.gmra.mrb[0].mxu0 %v5106_v33  ;;  %4302 = vmatprep.subr.bf16.mxu1 %v5132_v41 }
 0x3e5   : > { %3482 = vmatprep.mubr.msk.f32.mxu0 %vm5133_vm4, %v5134_v44  ;;  %4280 = vmatpush3.bf16.msra.mxu0 %v5582_v24 }
 0x3e6   : > { %4281 = vmatprep.subr.bf16.mxu0 %v5132_v41 }
 0x3e9   : > { %4283 = vmatpush3.bf16.msra.mxu0 %v5585_v32 }
 0x3ea   : > { %4284 = vmatprep.subr.bf16.mxu0 %v5132_v41 }
 0x3ed   : > { %4286 = vmatpush3.bf16.msra.mxu0 %v5589_v39 }
 0x3ee   : > { %4287 = vmatprep.subr.bf16.mxu0 %v5132_v41 }
 0x3f1   : > { %4289 = vmatpush3.bf16.msra.mxu0 %v5597_v56 }
 0x3f2   : > { %4290 = vmatprep.subr.bf16.mxu0 %v5132_v41 }
 0x3f5   : > { %4292 = vmatpush3.bf16.msra.mxu0 %v5601_v60 }
 0x3f6   : > { %4293 = vmatprep.subr.bf16.mxu0 %v5132_v41 }
 0x3f9   : > { %4295 = vmatpush3.bf16.msra.mxu0 %v5605_v4 }
 0x3fa   : > { %4296 = vmatprep.subr.bf16.mxu0 %v5132_v41 }
 0x3fd   : > { %4298 = vmatpush3.bf16.msra.mxu0 %v5608_v8 }
 0x3fe   : > { %4299 = vmatprep.subr.bf16.mxu0 %v5132_v41 }
 0x401   : > { %4301 = vmatpush3.bf16.msra.mxu0 %v5612_v12 }
 0x402   : > { %4326 = vmatprep.subr.bf16.mxu0 %v5132_v41 }
 0x4b7   : > { %v1014_v40 = vpop.f32.mrb[0].mxu0 }
 0x4b8   : > { %v1015_v43 = vadd.f32 %v5474_v25, %v1014_v40  ;;  %v3414_v46 = vpop.f32.mrb[1].mxu0 }
 0x4ba   : > { %v1019_v47 = vmin.f32 %v1015_v43, 0.0  ;;  %vm1018_vm5 = vcmp.gt.f32.partialorder %v1015_v43, 0.0 }
 0x4bc   : > { %v1020_v48 = vmul.f32 1.442695, %v1019_v47 }
 0x4be   : > { %4840 = vpow2.f32 %v1020_v48  ;;  %v1214_v48 = vld [vmem:[#allocation12 + $0x30] sm:$0xff] }
 0x4c8   : > { %v4841_v49 = vpop.eup %4840 }
 0x4c9   : > { %v2872_v27 = vadd.f32 -1.0, %v4841_v49  ;;  %v1215_v49 = vld [vmem:[#allocation12 + $0x38] sm:$0xff] }
 0x4cb   : > { %v1023_v51 = vsel %vm1018_vm5, %v1015_v43, %v2872_v27  ;;  %v5632_v27 = vpack.c.bf16 %v1215_v49, %v1214_v48  ;;  %vm2818_vm5 = vcmask (%p927_p3), 9216  }
 0x4cc   : > { %3448 = vmatmul.mubr.f32.vlgmr.msra.gmra.mrb[0].mxu1 %v1023_v51  ;;  %v1216_v51 = vld [vmem:[#allocation12 + $0x40] sm:$0xff] }
 0x4cd   : > { %3517 = vmatprep.mubr.msk.f32.mxu1 %vm5133_vm4, %v5134_v44  ;;  %4304 = vmatpush3.bf16.msra.mxu1 %v5617_v36  ;;  %v5636_v54 = vpack.c.bf16 %v1217_v53, %v1216_v51 }
 0x4ce   : > { %4305 = vmatprep.subr.bf16.mxu1 %v5132_v41 }
 0x4d1   : > { %4307 = vmatpush3.bf16.msra.mxu1 %v5620_v17 }
 0x4d2   : > { %4308 = vmatprep.subr.bf16.mxu1 %v5132_v41 }
 0x4d5   : > { %4310 = vmatpush3.bf16.msra.mxu1 %v5624_v22 }
 0x4d6   : > { %4311 = vmatprep.subr.bf16.mxu1 %v5132_v41 }
 0x4d9   : > { %4313 = vmatpush3.bf16.msra.mxu1 %v5632_v27 }
 0x4da   : > { %4314 = vmatprep.subr.bf16.mxu1 %v5132_v41 }
 0x4dd   : > { %4316 = vmatpush3.bf16.msra.mxu1 %v5636_v54 }
 0x4de   : > { %4317 = vmatprep.subr.bf16.mxu1 %v5132_v41 }
 0x4e1   : > { %4319 = vmatpush3.bf16.msra.mxu1 %v5640_v0 }
 0x4e2   : > { %4320 = vmatprep.subr.bf16.mxu1 %v5132_v41 }
 0x4e5   : > { %4322 = vmatpush3.bf16.msra.mxu1 %v5643_v7 }
 0x4e6   : > { %4323 = vmatprep.subr.bf16.mxu1 %v5132_v41 }
 0x4e9   : > { %4325 = vmatpush3.bf16.msra.mxu1 %v5647_v13 }
 0x4ea   : > { %4350 = vmatprep.subr.bf16.mxu1 %v5132_v41 }
 0x59f   : > { %v1106_v23 = vpop.f32.mrb[0].mxu1 }
 0x5a0   : > { %v1107_v31 = vadd.f32 %v5479_v26, %v1106_v23  ;;  %v3449_v37 = vpop.f32.mrb[1].mxu1  ;;  %v5655_v23 = vpack.c.bf16 %v1303_v21, %v1302_v16  ;;  %v1312_v16 = vld [vmem:[#allocation14 + $0x60] sm:$0xff]  ;;  %v5691_v21 = vpack.c.bf16 %v1311_v35, %v1310_v34 }
 0x5a1   : > { %v1305_v37 = vld [vmem:[#allocation14 + $0x28] sm:$0xff] }
 0x5a2   : > { %v1111_v38 = vmin.f32 %v1107_v31, 0.0  ;;  %vm1110_vm6 = vcmp.gt.f32.partialorder %v1107_v31, 0.0 }
 0x5a4   : > { %v1112_v40 = vmul.f32 1.442695, %v1111_v38 }
 0x5a6   : > { %4842 = vpow2.f32 %v1112_v40 }
 0x5b0   : > { %v4843_v43 = vpop.eup %4842 }
 0x5b1   : > { %v2873_v46 = vadd.f32 -1.0, %v4843_v43 }
 0x5b3   : > { %v1115_v47 = vsel %vm1110_vm6, %v1107_v31, %v2873_v46  ;;  %v1304_v31 = vld [vmem:[#allocation14 + $0x20] sm:$0xff] }
 0x5b4   : > { %3483 = vmatmul.mubr.f32.vlgmr.msra.gmra.mrb[2].mxu0 %v1115_v47  ;;  %v5659_v38 = vpack.c.bf16 %v1305_v37, %v1304_v31  ;;  %v1313_v31 = vld [vmem:[#allocation14 + $0x68] sm:$0xff] }
 0x5b5   : > { %3552 = vmatprep.mubr.msk.f32.mxu0 %vm5133_vm4, %v5134_v44  ;;  %4328 = vmatpush3.bf16.msra.mxu0 %v5652_v18  ;;  %v5694_v37 = vpack.c.bf16 %v1313_v31, %v1312_v16 }
 0x5b6   : > { %4329 = vmatprep.subr.bf16.mxu0 %v5132_v41 }
 0x5b9   : > { %4331 = vmatpush3.bf16.msra.mxu0 %v5655_v23 }
 0x5ba   : > { %4332 = vmatprep.subr.bf16.mxu0 %v5132_v41 }
 0x5bd   : > { %4334 = vmatpush3.bf16.msra.mxu0 %v5659_v38 }
 0x5be   : > { %4335 = vmatprep.subr.bf16.mxu0 %v5132_v41 }
 0x5c1   : > { %4337 = vmatpush3.bf16.msra.mxu0 %v5683_v63 }
 0x5c2   : > { %4338 = vmatprep.subr.bf16.mxu0 %v5132_v41 }
 0x5c5   : > { %4340 = vmatpush3.bf16.msra.mxu0 %v5687_v10 }
 0x5c6   : > { %4341 = vmatprep.subr.bf16.mxu0 %v5132_v41 }
 0x5c9   : > { %4343 = vmatpush3.bf16.msra.mxu0 %v5691_v21 }
 0x5ca   : > { %4344 = vmatprep.subr.bf16.mxu0 %v5132_v41 }
 0x5cd   : > { %4346 = vmatpush3.bf16.msra.mxu0 %v5694_v37 }
 0x5ce   : > { %4347 = vmatprep.subr.bf16.mxu0 %v5132_v41 }
 0x687   : > { %v1198_v40 = vpop.f32.mrb[2].mxu0 }
 0x688   : > { %v1199_v43 = vadd.f32 %v5484_v28, %v1198_v40  ;;  %v3484_v46 = vpop.f32.mrb[3].mxu0  ;;  %v1314_v40 = vld [vmem:[#allocation14 + $0x70] sm:$0xff] }
 0x68a   : > { %v1203_v47 = vmin.f32 %v1199_v43, 0.0  ;;  %vm1202_vm7 = vcmp.gt.f32.partialorder %v1199_v43, 0.0 }
 0x68c   : > { %v1204_v48 = vmul.f32 1.442695, %v1203_v47 }
 0x68e   : > { %4844 = vpow2.f32 %v1204_v48 }
 0x698   : > { %v4845_v49 = vpop.eup %4844 }
 0x699   : > { %v2874_v51 = vadd.f32 -1.0, %v4845_v49 }
 0x69b   : > { %v1207_v53 = vsel %vm1202_vm7, %v1199_v43, %v2874_v51  ;;  %v1315_v43 = vld [vmem:[#allocation14 + $0x78] sm:$0xff] }
 0x69c   : > { %3518 = vmatmul.mubr.f32.vlgmr.msra.gmra.mrb[2].mxu1 %v1207_v53  ;;  %v5698_v46 = vpack.c.bf16 %v1315_v43, %v1314_v40 }
 0x69d   : > { %4352 = vmatpush3.bf16.msra.mxu1 %v5510_v42  ;;  %3587 = vmatprep.mubr.msk.f32.mxu1 %vm5133_vm4, %v5134_v44 }
 0x69e   : > { %4353 = vmatprep.subr.bf16.mxu1 %v5132_v41  ;;  %4349 = vmatpush3.bf16.msra.mxu0 %v5698_v46 }
 0x69f   : > { %4374 = vmatprep.subr.bf16.mxu0 %v5132_v41 }
 0x6a1   : > { %4355 = vmatpush3.bf16.msra.mxu1 %v5518_v45 }
 0x6a2   : > { %4356 = vmatprep.subr.bf16.mxu1 %v5132_v41 }
 0x6a5   : > { %4358 = vmatpush3.bf16.msra.mxu1 %v5524_v52 }
 0x6a6   : > { %4359 = vmatprep.subr.bf16.mxu1 %v5132_v41 }
 0x6a9   : > { %4361 = vmatpush3.bf16.msra.mxu1 %v5532_v58 }
 0x6aa   : > { %4362 = vmatprep.subr.bf16.mxu1 %v5132_v41 }
 0x6ad   : > { %4364 = vmatpush3.bf16.msra.mxu1 %v5540_v62 }
 0x6ae   : > { %4365 = vmatprep.subr.bf16.mxu1 %v5132_v41 }
 0x6b1   : > { %4367 = vmatpush3.bf16.msra.mxu1 %v5546_v1 }
 0x6b2   : > { %4368 = vmatprep.subr.bf16.mxu1 %v5132_v41 }
 0x6b5   : > { %4370 = vmatpush3.bf16.msra.mxu1 %v5550_v5 }
 0x6b6   : > { %4371 = vmatprep.subr.bf16.mxu1 %v5132_v41 }
 0x6b9   : > { %4373 = vmatpush3.bf16.msra.mxu1 %v5554_v9 }
 0x6ba   : > { %4398 = vmatprep.subr.bf16.mxu1 %v5132_v41 }
 0x76f   : > { %v1290_v47 = vpop.f32.mrb[2].mxu1 }
 0x770   : > { %v1291_v48 = vadd.f32 %v5489_v29, %v1290_v47  ;;  %v3519_v49 = vpop.f32.mrb[3].mxu1 }
 0x772   : > { %v1295_v51 = vmin.f32 %v1291_v48, 0.0  ;;  %vm1294_vm8 = vcmp.gt.f32.partialorder %v1291_v48, 0.0 }
 0x774   : > { %v1296_v53 = vmul.f32 1.442695, %v1295_v51 }
 0x776   : > { %4846 = vpow2.f32 %v1296_v53 }
 0x780   : > { %v4847_v57 = vpop.eup %4846 }
 0x781   : > { %v2875_v59 = vadd.f32 -1.0, %v4847_v57 }
 0x783   : > { %v1299_v2 = vsel %vm1294_vm8, %v1291_v48, %v2875_v59 }
 0x784   : > { %3553 = vmatmul.mubr.f32.vlgmr.msra.gmra.mrb[4].mxu0 %v1299_v2 }
 0x785   : > { %4376 = vmatpush3.bf16.msra.mxu0 %v5521_v50  ;;  %3622 = vmatprep.mubr.msk.f32.mxu0 %vm5133_vm4, %v5134_v44 }
 0x786   : > { %4377 = vmatprep.subr.bf16.mxu0 %v5132_v41 }
 0x789   : > { %4379 = vmatpush3.bf16.msra.mxu0 %v5528_v55 }
 0x78a   : > { %4380 = vmatprep.subr.bf16.mxu0 %v5132_v41 }
 0x78d   : > { %4382 = vmatpush3.bf16.msra.mxu0 %v5536_v61 }
 0x78e   : > { %4383 = vmatprep.subr.bf16.mxu0 %v5132_v41 }
 0x791   : > { %4385 = vmatpush3.bf16.msra.mxu0 %v5562_v11 }
 0x792   : > { %4386 = vmatprep.subr.bf16.mxu0 %v5132_v41 }
 0x795   : > { %4388 = vmatpush3.bf16.msra.mxu0 %v5566_v14 }
 0x796   : > { %4389 = vmatprep.subr.bf16.mxu0 %v5132_v41 }
 0x799   : > { %4391 = vmatpush3.bf16.msra.mxu0 %v5570_v15 }
 0x79a   : > { %4392 = vmatprep.subr.bf16.mxu0 %v5132_v41 }
 0x79d   : > { %4394 = vmatpush3.bf16.msra.mxu0 %v5573_v3 }
 0x79e   : > { %4395 = vmatprep.subr.bf16.mxu0 %v5132_v41 }
 0x7a1   : > { %4397 = vmatpush3.bf16.msra.mxu0 %v5577_v20 }
 0x7a2   : > { %4422 = vmatprep.subr.bf16.mxu0 %v5132_v41 }
 0x857   : > { %v1382_v19 = vpop.f32.mrb[4].mxu0 }
 0x858   : > { %v5723_v34 = vadd.f32 %v5494_v30, %v1382_v19  ;;  %v3554_v35 = vpop.f32.mrb[5].mxu0 }
 0x85a   : > { %v1386_v16 = vmul.f32 0.005, %v5723_v34 }
 0x85c   : > { %v1387_v31 = vadd.f32 %v5106_v33, %v1386_v16 }
 0x85e   : > { %3588 = vmatmul.mubr.f32.vlgmr.msra.gmra.mrb[4].mxu1 %v1387_v31 }
 0x85f   : > { %4400 = vmatpush3.bf16.msra.mxu1 %v5582_v24  ;;  %3657 = vmatprep.mubr.msk.f32.mxu1 %vm5133_vm4, %v5134_v44 }
 0x860   : > { %4401 = vmatprep.subr.bf16.mxu1 %v5132_v41 }
 0x863   : > { %4403 = vmatpush3.bf16.msra.mxu1 %v5585_v32 }
 0x864   : > { %4404 = vmatprep.subr.bf16.mxu1 %v5132_v41 }
 0x867   : > { %4406 = vmatpush3.bf16.msra.mxu1 %v5589_v39 }
 0x868   : > { %4407 = vmatprep.subr.bf16.mxu1 %v5132_v41 }
 0x86b   : > { %4409 = vmatpush3.bf16.msra.mxu1 %v5597_v56 }
 0x86c   : > { %4410 = vmatprep.subr.bf16.mxu1 %v5132_v41 }
 0x86f   : > { %4412 = vmatpush3.bf16.msra.mxu1 %v5601_v60 }
 0x870   : > { %4413 = vmatprep.subr.bf16.mxu1 %v5132_v41 }
 0x873   : > { %4415 = vmatpush3.bf16.msra.mxu1 %v5605_v4 }
 0x874   : > { %4416 = vmatprep.subr.bf16.mxu1 %v5132_v41 }
 0x877   : > { %4418 = vmatpush3.bf16.msra.mxu1 %v5608_v8 }
 0x878   : > { %4419 = vmatprep.subr.bf16.mxu1 %v5132_v41 }
 0x87b   : > { %4421 = vmatpush3.bf16.msra.mxu1 %v5612_v12 }
 0x87c   : > { %4446 = vmatprep.subr.bf16.mxu1 %v5132_v41 }
 0x931   : > { %v1454_v40 = vpop.f32.mrb[4].mxu1 }
 0x932   : > { %v1455_v43 = vadd.f32 %v5474_v25, %v1454_v40  ;;  %v3589_v47 = vpop.f32.mrb[5].mxu1 }
 0x934   : > { %v1459_v48 = vmin.f32 %v1455_v43, 0.0  ;;  %vm1458_vm9 = vcmp.gt.f32.partialorder %v1455_v43, 0.0 }
 0x936   : > { %v1460_v49 = vmul.f32 1.442695, %v1459_v48 }
 0x938   : > { %4848 = vpow2.f32 %v1460_v49 }
 0x942   : > { %v4849_v51 = vpop.eup %4848 }
 0x943   : > { %v2876_v53 = vadd.f32 -1.0, %v4849_v51 }
 0x945   : > { %v1463_v57 = vsel %vm1458_vm9, %v1455_v43, %v2876_v53 }
 0x946   : > { %3623 = vmatmul.mubr.f32.vlgmr.msra.gmra.mrb[6].mxu0 %v1463_v57 }
 0x947   : > { %4424 = vmatpush3.bf16.msra.mxu0 %v5617_v36  ;;  %3692 = vmatprep.mubr.msk.f32.mxu0 %vm5133_vm4, %v5134_v44 }
 0x948   : > { %4425 = vmatprep.subr.bf16.mxu0 %v5132_v41 }
 0x94b   : > { %4427 = vmatpush3.bf16.msra.mxu0 %v5620_v17 }
 0x94c   : > { %4428 = vmatprep.subr.bf16.mxu0 %v5132_v41 }
 0x94f   : > { %4430 = vmatpush3.bf16.msra.mxu0 %v5624_v22 }
 0x950   : > { %4431 = vmatprep.subr.bf16.mxu0 %v5132_v41 }
 0x953   : > { %4433 = vmatpush3.bf16.msra.mxu0 %v5632_v27 }
 0x954   : > { %4434 = vmatprep.subr.bf16.mxu0 %v5132_v41 }
 0x957   : > { %4436 = vmatpush3.bf16.msra.mxu0 %v5636_v54 }
 0x958   : > { %4437 = vmatprep.subr.bf16.mxu0 %v5132_v41 }
 0x95b   : > { %4439 = vmatpush3.bf16.msra.mxu0 %v5640_v0 }
 0x95c   : > { %4440 = vmatprep.subr.bf16.mxu0 %v5132_v41 }
 0x95f   : > { %4442 = vmatpush3.bf16.msra.mxu0 %v5643_v7 }
 0x960   : > { %4443 = vmatprep.subr.bf16.mxu0 %v5132_v41 }
 0x963   : > { %4445 = vmatpush3.bf16.msra.mxu0 %v5647_v13 }
 0x964   : > { %4470 = vmatprep.subr.bf16.mxu0 %v5132_v41 }
 0xa19   : > { %v1530_v59 = vpop.f32.mrb[6].mxu0 }
 0xa1a   : > { %v1531_v2 = vadd.f32 %v5479_v26, %v1530_v59  ;;  %v3624_v19 = vpop.f32.mrb[7].mxu0 }
 0xa1c   : > { %v1535_v35 = vmin.f32 %v1531_v2, 0.0  ;;  %vm1534_vm10 = vcmp.gt.f32.partialorder %v1531_v2, 0.0 }
 0xa1e   : > { %v1536_v16 = vmul.f32 1.442695, %v1535_v35 }
 0xa20   : > { %4850 = vpow2.f32 %v1536_v16 }
 0xa2a   : > { %v4851_v31 = vpop.eup %4850 }
 0xa2b   : > { %v2877_v40 = vadd.f32 -1.0, %v4851_v31 }
 0xa2d   : > { %v1539_v43 = vsel %vm1534_vm10, %v1531_v2, %v2877_v40 }
 0xa2e   : > { %3658 = vmatmul.mubr.f32.vlgmr.msra.gmra.mrb[6].mxu1 %v1539_v43 }
 0xa2f   : > { %4448 = vmatpush3.bf16.msra.mxu1 %v5652_v18  ;;  %3727 = vmatprep.mubr.msk.f32.mxu1 %vm5133_vm4, %v5134_v44 }
 0xa30   : > { %4449 = vmatprep.subr.bf16.mxu1 %v5132_v41 }
 0xa33   : > { %4451 = vmatpush3.bf16.msra.mxu1 %v5655_v23 }
 0xa34   : > { %4452 = vmatprep.subr.bf16.mxu1 %v5132_v41 }
 0xa37   : > { %4454 = vmatpush3.bf16.msra.mxu1 %v5659_v38 }
 0xa38   : > { %4455 = vmatprep.subr.bf16.mxu1 %v5132_v41 }
 0xa3b   : > { %4457 = vmatpush3.bf16.msra.mxu1 %v5683_v63 }
 0xa3c   : > { %4458 = vmatprep.subr.bf16.mxu1 %v5132_v41 }
 0xa3f   : > { %4460 = vmatpush3.bf16.msra.mxu1 %v5687_v10 }
 0xa40   : > { %4461 = vmatprep.subr.bf16.mxu1 %v5132_v41 }
 0xa43   : > { %4463 = vmatpush3.bf16.msra.mxu1 %v5691_v21 }
 0xa44   : > { %4464 = vmatprep.subr.bf16.mxu1 %v5132_v41 }
 0xa47   : > { %4466 = vmatpush3.bf16.msra.mxu1 %v5694_v37 }
 0xa48   : > { %4467 = vmatprep.subr.bf16.mxu1 %v5132_v41 }
 0xa4b   : > { %4469 = vmatpush3.bf16.msra.mxu1 %v5698_v46 }
 0xa4c   : > { %4494 = vmatprep.subr.bf16.mxu1 %v5132_v41 }
 0xb01   : > { %v1606_v47 = vpop.f32.mrb[6].mxu1 }
 0xb02   : > { %v1607_v48 = vadd.f32 %v5484_v28, %v1606_v47  ;;  %v3659_v49 = vpop.f32.mrb[7].mxu1 }
 0xb04   : > { %v1611_v51 = vmin.f32 %v1607_v48, 0.0  ;;  %vm1610_vm11 = vcmp.gt.f32.partialorder %v1607_v48, 0.0 }
 0xb06   : > { %v1612_v53 = vmul.f32 1.442695, %v1611_v51 }
 0xb08   : > { %4852 = vpow2.f32 %v1612_v53 }
 0xb12   : > { %v4853_v57 = vpop.eup %4852 }
 0xb13   : > { %v2878_v59 = vadd.f32 -1.0, %v4853_v57 }
 0xb15   : > { %v1615_v2 = vsel %vm1610_vm11, %v1607_v48, %v2878_v59 }
 0xb16   : > { %3693 = vmatmul.mubr.f32.vlgmr.msra.gmra.mrb[8].mxu0 %v1615_v2 }
 0xb17   : > { %4472 = vmatpush3.bf16.msra.mxu0 %v5510_v42  ;;  %3762 = vmatprep.mubr.msk.f32.mxu0 %vm5133_vm4, %v5134_v44 }
 0xb18   : > { %4473 = vmatprep.subr.bf16.mxu0 %v5132_v41 }
 0xb1b   : > { %4475 = vmatpush3.bf16.msra.mxu0 %v5518_v45 }
 0xb1c   : > { %4476 = vmatprep.subr.bf16.mxu0 %v5132_v41 }
 0xb1f   : > { %4478 = vmatpush3.bf16.msra.mxu0 %v5524_v52 }
 0xb20   : > { %4479 = vmatprep.subr.bf16.mxu0 %v5132_v41 }
 0xb23   : > { %4481 = vmatpush3.bf16.msra.mxu0 %v5532_v58 }
 0xb24   : > { %4482 = vmatprep.subr.bf16.mxu0 %v5132_v41 }
 0xb27   : > { %4484 = vmatpush3.bf16.msra.mxu0 %v5540_v62 }
 0xb28   : > { %4485 = vmatprep.subr.bf16.mxu0 %v5132_v41 }
 0xb2b   : > { %4487 = vmatpush3.bf16.msra.mxu0 %v5546_v1 }
 0xb2c   : > { %4488 = vmatprep.subr.bf16.mxu0 %v5132_v41 }
 0xb2f   : > { %4490 = vmatpush3.bf16.msra.mxu0 %v5550_v5 }
 0xb30   : > { %4491 = vmatprep.subr.bf16.mxu0 %v5132_v41 }
 0xb33   : > { %4493 = vmatpush3.bf16.msra.mxu0 %v5554_v9 }
 0xb34   : > { %4518 = vmatprep.subr.bf16.mxu0 %v5132_v41 }
 0xbe9   : > { %v1682_v19 = vpop.f32.mrb[8].mxu0 }
 0xbea   : > { %v1683_v35 = vadd.f32 %v5489_v29, %v1682_v19  ;;  %v3694_v16 = vpop.f32.mrb[9].mxu0 }
 0xbec   : > { %v1687_v31 = vmin.f32 %v1683_v35, 0.0  ;;  %vm1686_vm12 = vcmp.gt.f32.partialorder %v1683_v35, 0.0 }
 0xbee   : > { %v1688_v40 = vmul.f32 1.442695, %v1687_v31 }
 0xbf0   : > { %4854 = vpow2.f32 %v1688_v40 }
 0xbfa   : > { %v4855_v43 = vpop.eup %4854 }
 0xbfb   : > { %v2879_v47 = vadd.f32 -1.0, %v4855_v43 }
 0xbfd   : > { %v1691_v48 = vsel %vm1686_vm12, %v1683_v35, %v2879_v47 }
 0xbfe   : > { %3728 = vmatmul.mubr.f32.vlgmr.msra.gmra.mrb[8].mxu1 %v1691_v48 }
 0xbff   : > { %4496 = vmatpush3.bf16.msra.mxu1 %v5521_v50  ;;  %3797 = vmatprep.mubr.msk.f32.mxu1 %vm5133_vm4, %v5134_v44 }
 0xc00   : > { %4497 = vmatprep.subr.bf16.mxu1 %v5132_v41 }
 0xc03   : > { %4499 = vmatpush3.bf16.msra.mxu1 %v5528_v55 }
 0xc04   : > { %4500 = vmatprep.subr.bf16.mxu1 %v5132_v41 }
 0xc07   : > { %4502 = vmatpush3.bf16.msra.mxu1 %v5536_v61 }
 0xc08   : > { %4503 = vmatprep.subr.bf16.mxu1 %v5132_v41 }
 0xc0b   : > { %4505 = vmatpush3.bf16.msra.mxu1 %v5562_v11 }
 0xc0c   : > { %4506 = vmatprep.subr.bf16.mxu1 %v5132_v41 }
 0xc0f   : > { %4508 = vmatpush3.bf16.msra.mxu1 %v5566_v14 }
 0xc10   : > { %4509 = vmatprep.subr.bf16.mxu1 %v5132_v41 }
 0xc13   : > { %4511 = vmatpush3.bf16.msra.mxu1 %v5570_v15 }
 0xc14   : > { %4512 = vmatprep.subr.bf16.mxu1 %v5132_v41 }
 0xc17   : > { %4514 = vmatpush3.bf16.msra.mxu1 %v5573_v3 }
 0xc18   : > { %4515 = vmatprep.subr.bf16.mxu1 %v5132_v41 }
 0xc1b   : > { %4517 = vmatpush3.bf16.msra.mxu1 %v5577_v20 }
 0xc1c   : > { %4542 = vmatprep.subr.bf16.mxu1 %v5132_v41 }
 0xcd1   : > { %v1758_v49 = vpop.f32.mrb[8].mxu1 }
 0xcd2   : > { %v5822_v51 = vadd.f32 %v5494_v30, %v1758_v49  ;;  %v3729_v53 = vpop.f32.mrb[9].mxu1 }
 0xcd4   : > { %v1762_v57 = vmul.f32 0.005, %v5822_v51 }
 0xcd6   : > { %v1763_v59 = vadd.f32 %v5106_v33, %v1762_v57 }
 0xcd8   : > { %3763 = vmatmul.mubr.f32.vlgmr.msra.gmra.mrb[10].mxu0 %v1763_v59 }
 0xcd9   : > { %4520 = vmatpush3.bf16.msra.mxu0 %v5582_v24  ;;  %3832 = vmatprep.mubr.msk.f32.mxu0 %vm5133_vm4, %v5134_v44 }
 0xcda   : > { %4521 = vmatprep.subr.bf16.mxu0 %v5132_v41 }
 0xcdd   : > { %4523 = vmatpush3.bf16.msra.mxu0 %v5585_v32 }
 0xcde   : > { %4524 = vmatprep.subr.bf16.mxu0 %v5132_v41 }
 0xce1   : > { %4526 = vmatpush3.bf16.msra.mxu0 %v5589_v39 }
 0xce2   : > { %4527 = vmatprep.subr.bf16.mxu0 %v5132_v41 }
 0xce5   : > { %4529 = vmatpush3.bf16.msra.mxu0 %v5597_v56 }
 0xce6   : > { %4530 = vmatprep.subr.bf16.mxu0 %v5132_v41 }
 0xce9   : > { %4532 = vmatpush3.bf16.msra.mxu0 %v5601_v60 }
 0xcea   : > { %4533 = vmatprep.subr.bf16.mxu0 %v5132_v41 }
 0xced   : > { %4535 = vmatpush3.bf16.msra.mxu0 %v5605_v4 }
 0xcee   : > { %4536 = vmatprep.subr.bf16.mxu0 %v5132_v41 }
 0xcf1   : > { %4538 = vmatpush3.bf16.msra.mxu0 %v5608_v8 }
 0xcf2   : > { %4539 = vmatprep.subr.bf16.mxu0 %v5132_v41 }
 0xcf5   : > { %4541 = vmatpush3.bf16.msra.mxu0 %v5612_v12 }
 0xcf6   : > { %4566 = vmatprep.subr.bf16.mxu0 %v5132_v41 }
 0xdab   : > { %v1830_v2 = vpop.f32.mrb[10].mxu0 }
 0xdac   : > { %v1831_v19 = vadd.f32 %v5474_v25, %v1830_v2  ;;  %v3764_v35 = vpop.f32.mrb[11].mxu0 }
 0xdae   : > { %v1835_v16 = vmin.f32 %v1831_v19, 0.0  ;;  %vm1834_vm13 = vcmp.gt.f32.partialorder %v1831_v19, 0.0 }
 0xdb0   : > { %v1836_v31 = vmul.f32 1.442695, %v1835_v16 }
 0xdb2   : > { %4856 = vpow2.f32 %v1836_v31 }
 0xdbc   : > { %v4857_v40 = vpop.eup %4856 }
 0xdbd   : > { %v2880_v43 = vadd.f32 -1.0, %v4857_v40 }
 0xdbf   : > { %v1839_v47 = vsel %vm1834_vm13, %v1831_v19, %v2880_v43 }
 0xdc0   : > { %3798 = vmatmul.mubr.f32.vlgmr.msra.gmra.mrb[10].mxu1 %v1839_v47 }
 0xdc1   : > { %4544 = vmatpush3.bf16.msra.mxu1 %v5617_v36  ;;  %3867 = vmatprep.mubr.msk.f32.mxu1 %vm5133_vm4, %v5134_v44 }
 0xdc2   : > { %4545 = vmatprep.subr.bf16.mxu1 %v5132_v41 }
 0xdc5   : > { %4547 = vmatpush3.bf16.msra.mxu1 %v5620_v17 }
 0xdc6   : > { %4548 = vmatprep.subr.bf16.mxu1 %v5132_v41 }
 0xdc9   : > { %4550 = vmatpush3.bf16.msra.mxu1 %v5624_v22 }
 0xdca   : > { %4551 = vmatprep.subr.bf16.mxu1 %v5132_v41 }
 0xdcd   : > { %4553 = vmatpush3.bf16.msra.mxu1 %v5632_v27 }
 0xdce   : > { %4554 = vmatprep.subr.bf16.mxu1 %v5132_v41 }
 0xdd1   : > { %4556 = vmatpush3.bf16.msra.mxu1 %v5636_v54 }
 0xdd2   : > { %4557 = vmatprep.subr.bf16.mxu1 %v5132_v41 }
 0xdd5   : > { %4559 = vmatpush3.bf16.msra.mxu1 %v5640_v0 }
 0xdd6   : > { %4560 = vmatprep.subr.bf16.mxu1 %v5132_v41 }
 0xdd9   : > { %4562 = vmatpush3.bf16.msra.mxu1 %v5643_v7 }
 0xdda   : > { %4563 = vmatprep.subr.bf16.mxu1 %v5132_v41 }
 0xddd   : > { %4565 = vmatpush3.bf16.msra.mxu1 %v5647_v13 }
 0xdde   : > { %4590 = vmatprep.subr.bf16.mxu1 %v5132_v41 }
 0xe93   : > { %v1906_v48 = vpop.f32.mrb[10].mxu1 }
 0xe94   : > { %v1907_v49 = vadd.f32 %v5479_v26, %v1906_v48  ;;  %v3799_v53 = vpop.f32.mrb[11].mxu1 }
 0xe96   : > { %v1911_v57 = vmin.f32 %v1907_v49, 0.0  ;;  %vm1910_vm14 = vcmp.gt.f32.partialorder %v1907_v49, 0.0 }
 0xe98   : > { %v1912_v59 = vmul.f32 1.442695, %v1911_v57 }
 0xe9a   : > { %4858 = vpow2.f32 %v1912_v59 }
 0xea4   : > { %v4859_v2 = vpop.eup %4858 }
 0xea5   : > { %v2881_v19 = vadd.f32 -1.0, %v4859_v2 }
 0xea7   : > { %v1915_v35 = vsel %vm1910_vm14, %v1907_v49, %v2881_v19 }
 0xea8   : > { %3833 = vmatmul.mubr.f32.vlgmr.msra.gmra.mrb[12].mxu0 %v1915_v35 }
 0xea9   : > { %4568 = vmatpush3.bf16.msra.mxu0 %v5652_v18  ;;  %3902 = vmatprep.mubr.msk.f32.mxu0 %vm5133_vm4, %v5134_v44 }
 0xeaa   : > { %4569 = vmatprep.subr.bf16.mxu0 %v5132_v41 }
 0xead   : > { %4571 = vmatpush3.bf16.msra.mxu0 %v5655_v23 }
 0xeae   : > { %4572 = vmatprep.subr.bf16.mxu0 %v5132_v41 }
 0xeb1   : > { %4574 = vmatpush3.bf16.msra.mxu0 %v5659_v38 }
 0xeb2   : > { %4575 = vmatprep.subr.bf16.mxu0 %v5132_v41 }
 0xeb5   : > { %4577 = vmatpush3.bf16.msra.mxu0 %v5683_v63 }
 0xeb6   : > { %4578 = vmatprep.subr.bf16.mxu0 %v5132_v41 }
 0xeb9   : > { %4580 = vmatpush3.bf16.msra.mxu0 %v5687_v10 }
 0xeba   : > { %4581 = vmatprep.subr.bf16.mxu0 %v5132_v41 }
 0xebd   : > { %4583 = vmatpush3.bf16.msra.mxu0 %v5691_v21 }
 0xebe   : > { %4584 = vmatprep.subr.bf16.mxu0 %v5132_v41 }
 0xec1   : > { %4586 = vmatpush3.bf16.msra.mxu0 %v5694_v37 }
 0xec2   : > { %4587 = vmatprep.subr.bf16.mxu0 %v5132_v41 }
 0xec5   : > { %4589 = vmatpush3.bf16.msra.mxu0 %v5698_v46 }
 0xec6   : > { %4614 = vmatprep.subr.bf16.mxu0 %v5132_v41 }
 0xf7b   : > { %v1982_v16 = vpop.f32.mrb[12].mxu0 }
 0xf7c   : > { %v1983_v31 = vadd.f32 %v5484_v28, %v1982_v16  ;;  %v3834_v40 = vpop.f32.mrb[13].mxu0 }
 0xf7e   : > { %v1987_v43 = vmin.f32 %v1983_v31, 0.0  ;;  %vm1986_vm15 = vcmp.gt.f32.partialorder %v1983_v31, 0.0 }
 0xf80   : > { %v1988_v47 = vmul.f32 1.442695, %v1987_v43 }
 0xf82   : > { %4860 = vpow2.f32 %v1988_v47 }
 0xf8c   : > { %v4861_v48 = vpop.eup %4860 }
 0xf8d   : > { %v2882_v49 = vadd.f32 -1.0, %v4861_v48  ;;  %v2532_v48 = vld [vmem:[#allocation15] sm:$0xff] (%p927_p3) }
 0xf8f   : > { %v1991_v53 = vsel %vm1986_vm15, %v1983_v31, %v2882_v49  ;;  %v2533_v49 = vld [vmem:[#allocation15 + $0x8] sm:$0xff] (%p927_p3) }
 0xf90   : > { %3868 = vmatmul.mubr.f32.vlgmr.msra.gmra.mrb[12].mxu1 %v1991_v53  ;;  %v2534_v53 = vld [vmem:[#allocation15 + $0x10] sm:$0xff] (%p927_p3) }
 0xf91   : > { %4592 = vmatpush3.bf16.msra.mxu1 %v5510_v42  ;;  %3937 = vmatprep.mubr.msk.f32.mxu1 %vm5133_vm4, %v5134_v44 }
 0xf92   : > { %4593 = vmatprep.subr.bf16.mxu1 %v5132_v41 }
 0xf95   : > { %4595 = vmatpush3.bf16.msra.mxu1 %v5518_v45 }
 0xf96   : > { %4596 = vmatprep.subr.bf16.mxu1 %v5132_v41 }
 0xf99   : > { %4598 = vmatpush3.bf16.msra.mxu1 %v5524_v52 }
 0xf9a   : > { %4599 = vmatprep.subr.bf16.mxu1 %v5132_v41 }
 0xf9d   : > { %4601 = vmatpush3.bf16.msra.mxu1 %v5532_v58 }
 0xf9e   : > { %4602 = vmatprep.subr.bf16.mxu1 %v5132_v41 }
 0xfa1   : > { %4604 = vmatpush3.bf16.msra.mxu1 %v5540_v62 }
 0xfa2   : > { %4605 = vmatprep.subr.bf16.mxu1 %v5132_v41 }
 0xfa5   : > { %4607 = vmatpush3.bf16.msra.mxu1 %v5546_v1 }
 0xfa6   : > { %4608 = vmatprep.subr.bf16.mxu1 %v5132_v41 }
 0xfa9   : > { %4610 = vmatpush3.bf16.msra.mxu1 %v5550_v5 }
 0xfaa   : > { %4611 = vmatprep.subr.bf16.mxu1 %v5132_v41 }
 0xfad   : > { %4613 = vmatpush3.bf16.msra.mxu1 %v5554_v9 }
 0xfae   : > { %4638 = vmatprep.subr.bf16.mxu1 %v5132_v41 }
0x1063   : > { %v2058_v42 = vpop.f32.mrb[12].mxu1 }
0x1064   : > { %v2059_v45 = vadd.f32 %v5489_v29, %v2058_v42  ;;  %v3869_v52 = vpop.f32.mrb[13].mxu1  ;;  %v4710_v42 = vpack.c.bf16 (%p927_p3), %v2533_v49, %v2532_v48  ;;  %v2690_v48 = vld [vmem:[#allocation17 + $0x70] sm:$0xff] (%p927_p3)  ;;  %v2691_v49 = vld [vmem:[#allocation17 + $0x78] sm:$0xff] (%p927_p3) }
0x1066   : > { %v2063_v58 = vmin.f32 %v2059_v45, 0.0  ;;  %vm2062_vm0 = vcmp.gt.f32.partialorder %v2059_v45, 0.0 }
0x1068   : > { %v2064_v62 = vmul.f32 1.442695, %v2063_v58  ;;  %v2536_v58 = vld [vmem:[#allocation15 + $0x20] sm:$0xff] (%p927_p3) }
0x106a   : > { %4862 = vpow2.f32 %v2064_v62  ;;  %v2537_v62 = vld [vmem:[#allocation15 + $0x28] sm:$0xff] (%p927_p3) }
0x1074   : > { %v4863_v57 = vpop.eup %4862 }
0x1075   : > { %v2883_v59 = vadd.f32 -1.0, %v4863_v57  ;;  %v4718_v57 = vpack.c.bf16 (%p927_p3), %v2537_v62, %v2536_v58 }
0x1077   : > { %v2067_v1 = vsel %vm2062_vm0, %v2059_v45, %v2883_v59  ;;  %v2535_v45 = vld [vmem:[#allocation15 + $0x18] sm:$0xff] (%p927_p3)  ;;  %v2538_v59 = vld [vmem:[#allocation15 + $0x30] sm:$0xff] (%p927_p3) }
0x1078   : > { %3903 = vmatmul.mubr.f32.vlgmr.msra.gmra.mrb[14].mxu0 %v2067_v1  ;;  %v4714_v52 = vpack.c.bf16 (%p927_p3), %v2535_v45, %v2534_v53  ;;  %v4770_v53 = vpack.c.bf16 (%p927_p3), %v2691_v49, %v2690_v48 }
0x1079   : > { %4616 = vmatpush3.bf16.msra.mxu0 %v5521_v50  ;;  %3972 = vmatprep.mubr.msk.f32.mxu0 %vm5133_vm4, %v5134_v44  ;;  %v2514_v50 = vmul.f32 2.0, %v5822_v51 }
0x107a   : > { %4617 = vmatprep.subr.bf16.mxu0 %v5132_v41 }
0x107b   : > { %v2515_v9 = vadd.f32 %v2514_v50, %v5723_v34 }
0x107d   : > { %4619 = vmatpush3.bf16.msra.mxu0 %v5528_v55 }
0x107e   : > { %4620 = vmatprep.subr.bf16.mxu0 %v5132_v41 }
0x1081   : > { %4622 = vmatpush3.bf16.msra.mxu0 %v5536_v61 }
0x1082   : > { %4623 = vmatprep.subr.bf16.mxu0 %v5132_v41 }
0x1085   : > { %4625 = vmatpush3.bf16.msra.mxu0 %v5562_v11 }
0x1086   : > { %4626 = vmatprep.subr.bf16.mxu0 %v5132_v41 }
0x1089   : > { %4628 = vmatpush3.bf16.msra.mxu0 %v5566_v14 }
0x108a   : > { %4629 = vmatprep.subr.bf16.mxu0 %v5132_v41 }
0x108d   : > { %4631 = vmatpush3.bf16.msra.mxu0 %v5570_v15 }
0x108e   : > { %4632 = vmatprep.subr.bf16.mxu0 %v5132_v41 }
0x1091   : > { %4634 = vmatpush3.bf16.msra.mxu0 %v5573_v3 }
0x1092   : > { %4635 = vmatprep.subr.bf16.mxu0 %v5132_v41 }
0x1095   : > { %4637 = vmatpush3.bf16.msra.mxu0 %v5577_v20 }
0x1096   : > { %4662 = vmatprep.subr.bf16.mxu0 %v5132_v41 }
0x114b   : > { %v2134_v55 = vpop.f32.mrb[14].mxu0 }
0x114c   : > { %v2135_v61 = vadd.f32 %v5494_v30, %v2134_v55  ;;  %v3904_v5 = vpop.f32.mrb[15].mxu0  ;;  %v2539_v55 = vld [vmem:[#allocation15 + $0x38] sm:$0xff] (%p927_p3) }
0x114e   : > { %v2138_v11 = vmul.f32 0.01, %v2135_v61  ;;  %v2516_v14 = vmul.f32 2.0, %v2135_v61 }
0x1150   : > { %v2139_v15 = vadd.f32 %v5106_v33, %v2138_v11  ;;  %v5924_v2 = vadd.f32 %v2516_v14, %v2515_v9  ;;  %v2540_v11 = vld [vmem:[#allocation15 + $0x40] sm:$0xff] (%p927_p3) }
0x1152   : > { %3938 = vmatmul.mubr.f32.vlgmr.msra.gmra.mrb[14].mxu1 %v2139_v15 }
0x1153   : > { %4640 = vmatpush3.bf16.msra.mxu1 %v5582_v24  ;;  %4007 = vmatprep.mubr.msk.f32.mxu1 %vm5133_vm4, %v5134_v44 }
0x1154   : > { %4641 = vmatprep.subr.bf16.mxu1 %v5132_v41 }
0x1157   : > { %4643 = vmatpush3.bf16.msra.mxu1 %v5585_v32 }
0x1158   : > { %4644 = vmatprep.subr.bf16.mxu1 %v5132_v41 }
0x115b   : > { %4646 = vmatpush3.bf16.msra.mxu1 %v5589_v39 }
0x115c   : > { %4647 = vmatprep.subr.bf16.mxu1 %v5132_v41 }
0x115f   : > { %4649 = vmatpush3.bf16.msra.mxu1 %v5597_v56 }
0x1160   : > { %4650 = vmatprep.subr.bf16.mxu1 %v5132_v41 }
0x1163   : > { %4652 = vmatpush3.bf16.msra.mxu1 %v5601_v60 }
0x1164   : > { %4653 = vmatprep.subr.bf16.mxu1 %v5132_v41 }
0x1167   : > { %4655 = vmatpush3.bf16.msra.mxu1 %v5605_v4 }
0x1168   : > { %4656 = vmatprep.subr.bf16.mxu1 %v5132_v41 }
0x116b   : > { %4658 = vmatpush3.bf16.msra.mxu1 %v5608_v8 }
0x116c   : > { %4659 = vmatprep.subr.bf16.mxu1 %v5132_v41 }
0x116f   : > { %4661 = vmatpush3.bf16.msra.mxu1 %v5612_v12 }
0x1170   : > { %4686 = vmatprep.subr.bf16.mxu1 %v5132_v41 }
0x1225   : > { %v2206_v3 = vpop.f32.mrb[14].mxu1 }
0x1226   : > { %v2207_v20 = vadd.f32 %v5474_v25, %v2206_v3  ;;  %v3939_v24 = vpop.f32.mrb[15].mxu1  ;;  %v2541_v3 = vld [vmem:[#allocation15 + $0x48] sm:$0xff] (%p927_p3) }
0x1227   :  { %v2680_v24 = vld [vmem:[#allocation17 + $0x20] sm:$0xff] (%p927_p3) }
0x1228   : > { %v2211_v32 = vmin.f32 %v2207_v20, 0.0  ;;  %vm2210_vm1 = vcmp.gt.f32.partialorder %v2207_v20, 0.0 }
0x122a   : > { %v2212_v39 = vmul.f32 1.442695, %v2211_v32  ;;  %v2681_v32 = vld [vmem:[#allocation17 + $0x28] sm:$0xff] (%p927_p3) }
0x122c   : > { %4864 = vpow2.f32 %v2212_v39 }
0x1236   : > { %v4865_v56 = vpop.eup %4864 }
0x1237   : > { %v2884_v60 = vadd.f32 -1.0, %v4865_v56  ;;  %v4726_v56 = vpack.c.bf16 (%p927_p3), %v2541_v3, %v2540_v11 }
0x1239   : > { %v2215_v4 = vsel %vm2210_vm1, %v2207_v20, %v2884_v60  ;;  %v2542_v60 = vld [vmem:[#allocation15 + $0x50] sm:$0xff] (%p927_p3) }
0x123a   : > { %3973 = vmatmul.mubr.f32.vlgmr.msra.gmra.mrb[16].mxu0 %v2215_v4  ;;  %v4750_v4 = vpack.c.bf16 (%p927_p3), %v2681_v32, %v2680_v24 }
0x123b   : > { %4664 = vmatpush3.bf16.msra.mxu0 %v5617_v36  ;;  %4042 = vmatprep.mubr.msk.f32.mxu0 %vm5133_vm4, %v5134_v44 }
0x123c   : > { %4665 = vmatprep.subr.bf16.mxu0 %v5132_v41 }
0x123f   : > { %4667 = vmatpush3.bf16.msra.mxu0 %v5620_v17 }
0x1240   : > { %4668 = vmatprep.subr.bf16.mxu0 %v5132_v41 }
0x1243   : > { %4670 = vmatpush3.bf16.msra.mxu0 %v5624_v22 }
0x1244   : > { %4671 = vmatprep.subr.bf16.mxu0 %v5132_v41 }
0x1247   : > { %4673 = vmatpush3.bf16.msra.mxu0 %v5632_v27 }
0x1248   : > { %4674 = vmatprep.subr.bf16.mxu0 %v5132_v41 }
0x124b   : > { %4676 = vmatpush3.bf16.msra.mxu0 %v5636_v54 }
0x124c   : > { %4677 = vmatprep.subr.bf16.mxu0 %v5132_v41 }
0x124f   : > { %4679 = vmatpush3.bf16.msra.mxu0 %v5640_v0 }
0x1250   : > { %4680 = vmatprep.subr.bf16.mxu0 %v5132_v41 }
0x1253   : > { %4682 = vmatpush3.bf16.msra.mxu0 %v5643_v7 }
0x1254   : > { %4683 = vmatprep.subr.bf16.mxu0 %v5132_v41 }
0x1257   : > { %4685 = vmatpush3.bf16.msra.mxu0 %v5647_v13 }
0x1258   :  { %4711 = vmatprep.subr.bf16.mxu0 (%p927_p3), %v4710_v42 }
0x130d   : > { %v2282_v8 = vpop.f32.mrb[16].mxu0 }
0x130e   : > { %v2283_v12 = vadd.f32 %v5479_v26, %v2282_v8  ;;  %v3974_v36 = vpop.f32.mrb[17].mxu0  ;;  %v2676_v26 = vld [vmem:[#allocation17] sm:$0xff] (%p927_p3)  ;;  %v2543_v8 = vld [vmem:[#allocation15 + $0x58] sm:$0xff] (%p927_p3) }
0x130f   :  { %v2683_v36 = vld [vmem:[#allocation17 + $0x38] sm:$0xff] (%p927_p3) }
0x1310   : > { %v2287_v17 = vmin.f32 %v2283_v12, 0.0  ;;  %vm2286_vm2 = vcmp.gt.f32.partialorder %v2283_v12, 0.0 }
0x1312   : > { %v2288_v22 = vmul.f32 1.442695, %v2287_v17  ;;  %v4730_v17 = vpack.c.bf16 (%p927_p3), %v2543_v8, %v2542_v60 }
0x1314   : > { %4866 = vpow2.f32 %v2288_v22  ;;  %v2544_v22 = vld [vmem:[#allocation15 + $0x60] sm:$0xff] (%p927_p3) }
0x131e   : > { %v4867_v27 = vpop.eup %4866 }
0x131f   : > { %v2885_v54 = vadd.f32 -1.0, %v4867_v27 }
0x1321   : > { %v2291_v34 = vsel %vm2286_vm2, %v2283_v12, %v2885_v54  ;;  %v2682_v12 = vld [vmem:[#allocation17 + $0x30] sm:$0xff] (%p927_p3)  ;;  %v2545_v54 = vld [vmem:[#allocation15 + $0x68] sm:$0xff] (%p927_p3) }
0x1322   : > { %4008 = vmatmul.mubr.f32.vlgmr.msra.gmra.mrb[16].mxu1 %v2291_v34  ;;  %v4754_v27 = vpack.c.bf16 (%p927_p3), %v2683_v36, %v2682_v12  ;;  %v2684_v34 = vld [vmem:[#allocation17 + $0x40] sm:$0xff] (%p927_p3) }
0x1323   : > { %4688 = vmatpush3.bf16.msra.mxu1 %v5652_v18  ;;  %4077 = vmatprep.mubr.msk.f32.mxu1 %vm5133_vm4, %v5134_v44 }
0x1324   : > { %4689 = vmatprep.subr.bf16.mxu1 %v5132_v41 }
0x1327   : > { %4691 = vmatpush3.bf16.msra.mxu1 %v5655_v23 }
0x1328   : > { %4692 = vmatprep.subr.bf16.mxu1 %v5132_v41 }
0x132b   : > { %4694 = vmatpush3.bf16.msra.mxu1 %v5659_v38 }
0x132c   : > { %4695 = vmatprep.subr.bf16.mxu1 %v5132_v41 }
0x132f   : > { %4697 = vmatpush3.bf16.msra.mxu1 %v5683_v63 }
0x1330   : > { %4698 = vmatprep.subr.bf16.mxu1 %v5132_v41 }
0x1333   : > { %4700 = vmatpush3.bf16.msra.mxu1 %v5687_v10 }
0x1334   : > { %4701 = vmatprep.subr.bf16.mxu1 %v5132_v41 }
0x1337   : > { %4703 = vmatpush3.bf16.msra.mxu1 %v5691_v21 }
0x1338   : > { %4704 = vmatprep.subr.bf16.mxu1 %v5132_v41 }
0x133b   : > { %4706 = vmatpush3.bf16.msra.mxu1 %v5694_v37 }
0x133c   : > { %4707 = vmatprep.subr.bf16.mxu1 %v5132_v41 }
0x133f   : > { %4709 = vmatpush3.bf16.msra.mxu1 %v5698_v46 }
0x13f5   : > { %v2358_v44 = vpop.f32.mrb[16].mxu1 }
0x13f6   : > { %v2359_v0 = vadd.f32 %v5484_v28, %v2358_v44  ;;  %v4009_v7 = vpop.f32.mrb[17].mxu1  ;;  %v2677_v28 = vld [vmem:[#allocation17 + $0x8] sm:$0xff] (%p927_p3) }
0x13f7   :  { %v4742_v15 = vpack.c.bf16 (%p927_p3), %v2677_v28, %v2676_v26  ;;  %v2685_v44 = vld [vmem:[#allocation17 + $0x48] sm:$0xff] (%p927_p3) }
0x13f8   : > { %v2363_v13 = vmin.f32 %v2359_v0, 0.0  ;;  %vm2362_vm3 = vcmp.gt.f32.partialorder %v2359_v0, 0.0 }
0x13f9   :  { %4743 = vmatprep.subr.bf16.mxu1 (%p927_p3), %v4742_v15 }
0x13fa   : > { %v2364_v18 = vmul.f32 1.442695, %v2363_v13 }
0x13fc   : > { %4868 = vpow2.f32 %v2364_v18 }
0x1406   : > { %v4869_v23 = vpop.eup %4868 }
0x1407   : > { %v2886_v38 = vadd.f32 -1.0, %v4869_v23  ;;  %v4734_v23 = vpack.c.bf16 (%p927_p3), %v2545_v54, %v2544_v22 }
0x1409   : > { %v2367_v63 = vsel %vm2362_vm3, %v2359_v0, %v2886_v38  ;;  %v2546_v38 = vld [vmem:[#allocation15 + $0x70] sm:$0xff] (%p927_p3) }
0x140a   : > { %4043 = vmatmul.mubr.f32.vlgmr.msra.gmra.mrb[18].mxu0 %v2367_v63  ;;  %v4758_v63 = vpack.c.bf16 (%p927_p3), %v2685_v44, %v2684_v34 }
0x140b   :  { %4713 = vmatpush3.bf16.msra.mxu0 (%p927_p3), %v4710_v42  ;;  %v2889_v42 = vld [vmem:[%s6055_s18] ss:$0 sm:$0xff] (%p927_p3) }
0x140c   :  { %4715 = vmatprep.subr.bf16.mxu0 (%p927_p3), %v4714_v52 }
0x140f   :  { %4717 = vmatpush3.bf16.msra.mxu0 (%p927_p3), %v4714_v52 }
0x1410   :  { %4719 = vmatprep.subr.bf16.mxu0 (%p927_p3), %v4718_v57 }
0x1413   :  { %4721 = vmatpush3.bf16.msra.mxu0 (%p927_p3), %v4718_v57 }
0x14dd   : > { %v2434_v10 = vpop.f32.mrb[18].mxu0 }
0x14de   : > { %v2435_v21 = vadd.f32 %v5489_v29, %v2434_v10  ;;  %v4044_v37 = vpop.f32.mrb[19].mxu0  ;;  %v2678_v29 = vld [vmem:[#allocation17 + $0x10] sm:$0xff] (%p927_p3)  ;;  %v2547_v10 = vld [vmem:[#allocation15 + $0x78] sm:$0xff] (%p927_p3) }
0x14df   :  { %v2687_v37 = vld [vmem:[#allocation17 + $0x58] sm:$0xff] (%p927_p3) }
0x14e0   : > { %v2439_v41 = vmin.f32 %v2435_v21, 0.0  ;;  %vm2438_vm4 = vcmp.gt.f32.partialorder %v2435_v21, 0.0 }
0x14e2   : > { %v2440_v51 = vmul.f32 1.442695, %v2439_v41 }
0x14e4   : > { %4870 = vpow2.f32 %v2440_v51 }
0x14ee   : > { %v4871_v46 = vpop.eup %4870 }
0x14ef   : > { %v2887_v19 = vadd.f32 -1.0, %v4871_v46  ;;  %v4738_v46 = vpack.c.bf16 (%p927_p3), %v2547_v10, %v2546_v38 }
0x14f1   : > { %v2443_v35 = vsel %vm2438_vm4, %v2435_v21, %v2887_v19  ;;  %v2686_v21 = vld [vmem:[#allocation17 + $0x50] sm:$0xff] (%p927_p3) }
0x14f2   : > { %4078 = vmatmul.mubr.f32.vlgmr.msra.gmra.mrb[18].mxu1 %v2443_v35  ;;  %v4762_v19 = vpack.c.bf16 (%p927_p3), %v2687_v37, %v2686_v21  ;;  %v2688_v35 = vld [vmem:[#allocation17 + $0x60] sm:$0xff] (%p927_p3) }
0x14f3   :  { %4745 = vmatpush3.bf16.msra.mxu1 (%p927_p3), %v4742_v15 }
0x15c5   : > { %v2510_v16 = vpop.f32.mrb[18].mxu1 }
0x15c6   : > { %v2511_v31 = vadd.f32 %v5494_v30, %v2510_v16  ;;  %v4079_v40 = vpop.f32.mrb[19].mxu1  ;;  %v4722_v30 = vpack.c.bf16 (%p927_p3), %v2539_v55, %v2538_v59  ;;  %v2689_v16 = vld [vmem:[#allocation17 + $0x68] sm:$0xff] (%p927_p3) }
0x15c8   : > { %v2518_v43 = vadd.f32 %v5924_v2, %v2511_v31  ;;  %929 = sbr.rel (!%p927_p3) target bundleno = 962 (0x3c2), region = 167  ;;  %v2679_v2 = vld [vmem:[#allocation17 + $0x18] sm:$0xff] (%p927_p3)  ;;  %4723 = vmatprep.subr.bf16.mxu0 (%p927_p3), %v4722_v30 }
0x15c9   :  { %v4746_v20 = vpack.c.bf16 (%p927_p3), %v2679_v2, %v2678_v29  ;;  %4725 = vmatpush3.bf16.msra.mxu0 (%p927_p3), %v4722_v30 }
0x15ca   : > { %v2519_v47 = vmul.f32 0.0016666667, %v2518_v43  ;;  %4727 = vmatprep.subr.bf16.mxu0 (%p927_p3), %v4726_v56  ;;  %v4766_v43 = vpack.c.bf16 (%p927_p3), %v2689_v16, %v2688_v35 }
0x15cb   :  { %4747 = vmatprep.subr.bf16.mxu1 (%p927_p3), %v4746_v20 }
0x15cc   : > { %v2520_v33 = vadd.f32 %v5106_v33, %v2519_v47   ;;  %4749 = vmatpush3.bf16.msra.mxu1 (%p927_p3), %v4746_v20 }
0x15cd   :  { %4751 = vmatprep.subr.bf16.mxu1 (%p927_p3), %v4750_v4  ;;  %4729 = vmatpush3.bf16.msra.mxu0 (%p927_p3), %v4726_v56 }
0x15ce   : > { %2523 = vst [vmem:[%s2522_s12] sm:$0x3] %v2520_v33  ;;  %4731 = vmatprep.subr.bf16.mxu0 (%p927_p3), %v4730_v17 }
0x15d0   :  { %4753 = vmatpush3.bf16.msra.mxu1 %v4750_v4 }
0x15d1   :  { %4755 = vmatprep.subr.bf16.mxu1 %v4754_v27  ;;  %4733 = vmatpush3.bf16.msra.mxu0 %v4730_v17 }
0x15d2   :  { %4735 = vmatprep.subr.bf16.mxu0 %v4734_v23 }
0x15d4   :  { %4757 = vmatpush3.bf16.msra.mxu1 %v4754_v27 }
0x15d5   :  { %v2524_v1 = vld [vmem:[#allocation3] sm:$0x3]  ;;  %v2525_v50 = vld [vmem:[#allocation3 + $0x2] sm:$0x3]  ;;  %v2526_v33 = vld [vmem:[#allocation3 + $0x4] sm:$0x3]  ;;  %4759 = vmatprep.subr.bf16.mxu1 %v4758_v63  ;;  %4737 = vmatpush3.bf16.msra.mxu0 %v4734_v23 }
0x15d6   :  { %v2527_v61 = vld [vmem:[#allocation3 + $0x6] sm:$0x3]  ;;  %v2563_v5 = vcombine.low %v2524_v1, %v2525_v50  ;;  %v2528_v0 = vld [vmem:[#allocation3 + $0x8] sm:$0x3]  ;;  %v2529_v7 = vld [vmem:[#allocation3 + $0xa] sm:$0x3]  ;;  %4739 = vmatprep.subr.bf16.mxu0 %v4738_v46 }
0x15d7   :  { %v2564_v9 = vcombine.low %v2526_v33, %v2527_v61  ;;  %v2530_v13 = vld [vmem:[#allocation3 + $0xc] sm:$0x3]  ;;  %v2531_v18 = vld [vmem:[#allocation3 + $0xe] sm:$0x3]  ;;  %v2580_v41 = vcombine.low %v2528_v0, %v2529_v7  ;;  %v2890_v1 = vld [vmem:[%s6078_s7] ss:$0 sm:$0xff] }
0x15d8   :  { %v2571_v25 = vrot.slane %v2563_v5, %v5378_v6  ;;  %v2581_v51 = vcombine.low %v2530_v13, %v2531_v18  ;;  %4761 = vmatpush3.bf16.msra.mxu1 %v4758_v63 }
0x15d9   :  { %v2578_v14 = vrot.slane %v2564_v9, %v5378_v6  ;;  %v2588_v31 = vrot.slane %v2580_v41, %v5378_v6  ;;  %4763 = vmatprep.subr.bf16.mxu1 %v4762_v19  ;;  %4741 = vmatpush3.bf16.msra.mxu0 %v4738_v46 }
0x15da   :  { %v2595_v40 = vrot.slane %v2581_v51, %v5378_v6 }
0x15db   :  { %v2579_v39 = vcombine.low %v2571_v25, %v2578_v14 }
0x15dc   :  { %v2596_v47 = vcombine.low %v2588_v31, %v2595_v40  ;;  %4765 = vmatpush3.bf16.msra.mxu1 %v4762_v19 }
0x15dd   :  { %4112 = vmatprep.mubr.f32.mxu0 %v2579_v39  ;;  %4767 = vmatprep.subr.bf16.mxu1 %v4766_v43 }
0x15de   :  { %4113 = vmatmul.mubr.f32.vlgmr.msra.gmra.mrb[0].mxu0 %v2596_v47 }
0x15e0   :  { %4769 = vmatpush3.bf16.msra.mxu1 %v4766_v43 }
0x15e1   :  { %4771 = vmatprep.subr.bf16.mxu1 %v4770_v53 }
0x15e4   :  { %4773 = vmatpush3.bf16.msra.mxu1 %v4770_v53 }
0x16b1   :  { %v4114_v45 = vpop.f32.mrb[0].mxu0 }
0x16b2   :  { %v2671_v52 = vadd.f32 %v4114_v45, %v2889_v42  ;;  %v2665_v58 = vpop.f32.mrb[1].mxu0 }
0x16b3   :  { %v2666_v62 = vadd.f32 %v2889_v42, %v2665_v58 }
0x16b4   :  { %v2675_v59 = vmax.f32 %v2671_v52, 0.0 }
0x16b5   :  { %v2674_v57 = vmax.f32 %v2666_v62, 0.0 }
0x16b7   :  { %4147 = vmatprep.mubr.f32.mxu1 %v2674_v57 }
0x16b8   :  { %4148 = vmatmul.mubr.f32.vlgmr.msra.gmra.mrb[0].mxu1 %v2675_v59 }
0x178b   :  { %v4149_v50 = vpop.f32.mrb[0].mxu1 }
0x178c   :  { %v2771_v55 = vadd.f32 %v4149_v50, %v2890_v1  ;;  %v2765_v33 = vpop.f32.mrb[1].mxu1 }
0x178d   :  { %v2766_v61 = vadd.f32 %v2890_v1, %v2765_v33 }
0x178e   :  { %v2793_v5 = vcombine.high %v2771_v55, %v2771_v55  ;;  %v2800_v9 = vrot.slane %v2771_v55, %v5378_v6 }
0x178f   :  { %v2776_v25 = vcombine.high %v2766_v61, %v2766_v61  ;;  %v2783_v26 = vrot.slane %v2766_v61, %v5378_v6 }
0x1790   :  { %v2807_v28 = vrot.slane %v2793_v5, %v5378_v6  ;;  %v2808_v29 = vcombine.high %v2800_v9, %v2800_v9  ;;  %2823 = vst.msk [vmem:[%s6079_s30 + $0x8] sm:$0x3] %vm2818_vm5, %v2800_v9 }
0x1791   :  { %v2790_v30 = vrot.slane %v2776_v25, %v5378_v6  ;;  %v2791_v11 = vcombine.high %v2783_v26, %v2783_v26  ;;  %2819 = vst.msk [vmem:[%s6079_s30] sm:$0x3] %vm2818_vm5, %v2783_v26 }
0x1792   :  { %v2809_v14 = vcombine.high %v2807_v28, %v2807_v28  ;;  %2824 = vst.msk [vmem:[%s6079_s30 + $0xa] sm:$0x3] %vm2818_vm5, %v2808_v29  ;;  %2825 = vst.msk [vmem:[%s6079_s30 + $0xc] sm:$0x3] %vm2818_vm5, %v2807_v28 }
0x1793   :  { %v2792_v15 = vcombine.high %v2790_v30, %v2790_v30  ;;  %2820 = vst.msk [vmem:[%s6079_s30 + $0x2] sm:$0x3] %vm2818_vm5, %v2791_v11  ;;  %2821 = vst.msk [vmem:[%s6079_s30 + $0x4] sm:$0x3] %vm2818_vm5, %v2790_v30 }
0x1794   :  { %2826 = vst.msk [vmem:[%s6079_s30 + $0xe] sm:$0x3] %vm2818_vm5, %v2809_v14 }
0x1795   :  { %2822 = vst.msk [vmem:[%s6079_s30 + $0x6] sm:$0x3] %vm2818_vm5, %v2792_v15 }
0x1796   :  { %2831 = vsyncpa [#allocation5], 1 }
0x1797   :  { %2832 = vsyncpa [#allocation7], 1 }
0x1798   :  { %2833 = vsyncpa [#allocation10], 1 }
0x1799   :  { %2834 = vsyncpa [#allocation13], 1 }
0x179a   :  { %2835 = vsyncpa [#allocation16], 1 }

</bundles_post_ra>
